<compile_context>
chip_gen: v5e
topology: v5e:2x2
jax: 0.10.0
libtpu: 0.0.40
codegen_flags: <defaults>
</compile_context>

<pallas_src>
import functools
import math

import jax
import jax.numpy as jnp
from jax import lax
from jax.experimental import pallas as pl
from jax.experimental.pallas import tpu as pltpu

ALPHA = 0.1
BETA = 1.5
ACT_SPARSITY = 0.65

_INT_MIN = -(2 ** 31)        # Python ints only (never closed-over jnp arrays)
_MAG_MASK = 0x7FFFFFFF


def _round_up(v, m):
    return (v + m - 1) // m * m


def _ksparse_kernel(x_ref, boost_ref, out_ref, cnt_ref, *,
                    k, f_real, sub_rows, n_col_bits):
    """Exact k-winners along lanes for one (block_rows, F_pad) row tile."""
    f_pad = x_ref.shape[-1]
    n_sub = x_ref.shape[0] // sub_rows
    kf = float(k)

    # Hoisted loop invariants (JAX does not CSE broadcasts inside loops).
    boost = boost_ref[...].astype(jnp.float32)                     # (1, F_pad)
    ones_cnt = jnp.ones((f_pad, 128), dtype=jnp.bfloat16)          # MXU popcount RHS
    if f_real < f_pad:
        lane_valid = lax.broadcasted_iota(jnp.int32, (sub_rows, f_pad), 1) < f_real
    else:
        lane_valid = None

    def lane_count(mask_bool):
        # Exact per-row popcount over lanes on the otherwise-idle MXU
        # (0/1 in bf16, f32 accumulation -> exact integers for F_pad < 2^24).
        m = mask_bool.astype(jnp.bfloat16)
        return jnp.dot(m, ones_cnt, preferred_element_type=jnp.float32)[:, :1]

    def row_max(v):                       # (sub, 1) -> scalar (sublane reduce)
        return jnp.max(v, axis=0, keepdims=True)[0, 0]

    cnt_ref[...] = jnp.zeros_like(cnt_ref)

    @pl.loop(0, n_sub)
    def _sub(r):
        r0 = pl.multiple_of(r * sub_rows, sub_rows)
        x = x_ref[pl.ds(r0, sub_rows), :]
        boosted = x.astype(jnp.float32) * boost

        # Signed order-preserving key: non-negative floats keep their bit
        # pattern; negative floats flip the 31 magnitude bits, so
        # float a > float b  <=>  key(a) > key(b)  as signed int32.
        bits = lax.bitcast_convert_type(boosted, jnp.int32)
        key = jnp.where(bits < 0, bits ^ _MAG_MASK, bits)
        if lane_valid is not None:
            key = jnp.where(lane_valid, key, _INT_MIN)   # padded lanes: minimum key
        # TODO(synk): -0.0 ranks just below +0.0 (floats compare equal) and NaN
        # ordering is unspecified; only matters for pathological ties at k.

        # ---- sign bit of the k-th largest key ------------------------------
        c0 = lane_count(key >= 0)
        neg = c0 < kf                                               # (sub, 1)
        t = jnp.where(neg, _INT_MIN, 0).astype(jnp.int32)
        cnt = jnp.where(neg, float(f_pad), c0)                      # count(key >= t)

        # ---- remaining 31 bits, MSB -> LSB, with early exit -----------------
        # Invariant: cnt == count(key >= t) >= k.  Stop as soon as every row
        # has cnt == k: then {key >= t} is exactly the top-k set.
        def cond_fn(carry):
            cur, _, _, unresolved = carry
            return jnp.logical_and(cur > 0, unresolved)

        def body_fn(carry):
            cur, t, cnt, _ = carry
            t_try = t + cur                         # bit `cur` is not set in t
            c = lane_count(key >= t_try)
            take = c >= kf
            t = jnp.where(take, t_try, t)
            cnt = jnp.where(take, c, cnt)
            return cur >> 1, t, cnt, row_max(cnt) > kf

        _, t, cnt, _ = lax.while_loop(
            cond_fn, body_fn,
            (jnp.int32(1 << 30), t, cnt, row_max(cnt) > kf))

        # ---- epilogue: strictly-above set + exact-k tie fixup ---------------
        gt = key > t
        cnt_gt = lane_count(gt)
        eq = key == t
        cnt_eq = cnt - cnt_gt                                       # == count(eq)
        need = kf - cnt_gt                                          # ties to keep (>= 0)
        has_excess = row_max(cnt_eq - need) > 0.5

        def with_tie_fixup():
            # Keep the `need` lowest-column ties (first occurrence, matching
            # lax.top_k): radix-select the need-th largest of (F_pad - col)
            # restricted to the tie lanes.  Fully unrolled (n_col_bits rounds).
            col = lax.broadcasted_iota(jnp.int32, (sub_rows, f_pad), 1)
            tie_key = jnp.where(eq, f_pad - col, 0)   # distinct positives on ties
            tt = jnp.zeros((sub_rows, 1), jnp.int32)
            for b in range(n_col_bits - 1, -1, -1):
                tt_try = tt + (1 << b)
                take = lane_count(tie_key >= tt_try) >= need
                tt = jnp.where(take, tt_try, tt)
            keep = jnp.logical_or(gt, tie_key >= tt)
            return jnp.where(keep, 1.0, 0.0)

        def no_ties():
            return jnp.where(jnp.logical_or(gt, eq), 1.0, 0.0)

        sel = lax.cond(has_excess, with_tie_fixup, no_ties)   # f32 0/1, exactly k per row

        # Re-read x (kept dead across the radix loop) for the masked store.
        x2 = x_ref[pl.ds(r0, sub_rows), :]
        keep = sel > 0.0
        out_ref[pl.ds(r0, sub_rows), :] = jnp.where(keep, x2, 0).astype(out_ref.dtype)

        # Duty-cycle partial counts: the module counts (output > 0) over batch.
        pos = jnp.where(jnp.logical_and(keep, x2 > 0), 1.0, 0.0)
        cnt_ref[...] += jnp.sum(pos, axis=0, keepdims=True)[None]


def activation_sparsity(x, duty_cycle, *, alpha=ALPHA, beta=BETA,
                        act_sparsity=ACT_SPARSITY, block_rows=256, sub_rows=32):
    """x: (N, F); duty_cycle: (F,).  Returns (out, new_duty_cycle) (training)."""
    x = jnp.asarray(x)
    n, f = x.shape
    k = math.floor((1.0 - act_sparsity) * f)
    dc = jnp.asarray(duty_cycle, jnp.float32)
    if k == 0:
        return jnp.zeros_like(x), (1.0 - alpha) * dc

    target = k / f
    # Boost computed once here (tiny (F,) op) instead of once per grid step.
    boost = jnp.exp(beta * (target - dc))

    f_pad = _round_up(f, 128)                  # lane-dense blocks
    n_col_bits = f_pad.bit_length()            # covers tie keys in [1, f_pad]
    assert f_pad < (1 << 24), "MXU f32 lane counts are exact only for F_pad < 2^24"

    # Selection slab: sweep 16-64.  Keep key (sub_rows * F_pad * 4 B) well
    # within the 256 KiB vreg file for large F.
    sub_rows = max(8, _round_up(sub_rows, 8))
    if f_pad >= 4096:
        sub_rows = min(sub_rows, 16)

    # Row tiling: large tiles amortize per-step overhead; the (dtype-aware)
    # cap keeps double-buffered in+out inside a ~16 MiB budget (fits v7x's
    # 64 MiB VMEM with headroom as well as v5e/v6e).  Also cap so there are
    # >= 2 grid tiles whenever possible: the row-tile axis is the only
    # "parallel" axis and v7x has 2 TensorCores.
    itemsize = jnp.dtype(x.dtype).itemsize
    max_rows = max(sub_rows, (16 * 1024 * 1024) // (4 * itemsize * f_pad))
    half_rows = _round_up(max(1, -(-n // 2)), sub_rows)
    block_rows = min(block_rows, max_rows, max(sub_rows, half_rows))
    block_rows = max(sub_rows, block_rows // sub_rows * sub_rows)
    n_pad = _round_up(n, block_rows)
    num_tiles = n_pad // block_rows

    # Skip the extra HBM pad pass when the shape is already aligned.
    if n_pad == n and f_pad == f:
        x_p = x
    else:
        x_p = jnp.zeros((n_pad, f_pad), x.dtype).at[:n, :f].set(x)
    boost_p = jnp.zeros((1, f_pad), jnp.float32).at[0, :f].set(boost)

    kern = functools.partial(_ksparse_kernel, k=k, f_real=f,
                             sub_rows=sub_rows, n_col_bits=n_col_bits)

    out_p, partial = pl.pallas_call(
        kern,
        out_shape=(jax.ShapeDtypeStruct((n_pad, f_pad), x.dtype),
                   jax.ShapeDtypeStruct((num_tiles, 1, f_pad), jnp.float32)),
        grid_spec=pltpu.PrefetchScalarGridSpec(
            num_scalar_prefetch=0,
            grid=(num_tiles,),
            in_specs=[
                pl.BlockSpec((block_rows, f_pad), lambda i: (i, 0)),
                pl.BlockSpec((1, f_pad), lambda i: (0, 0)),
            ],
            out_specs=(
                pl.BlockSpec((block_rows, f_pad), lambda i: (i, 0)),
                # Per-tile partial counts (no grid-resident accumulator) so the
                # row-tile axis can run megacore-parallel (v7x: 2 TensorCores).
                pl.BlockSpec((1, 1, f_pad), lambda i: (i, 0, 0)),
            ),
        ),
        compiler_params=pltpu.CompilerParams(
            dimension_semantics=("parallel",),
            vmem_limit_bytes=32 * 1024 * 1024),
    )(x_p, boost_p)

    out = out_p[:n, :f]
    counts = jnp.sum(partial[:, 0, :f], axis=0)   # padded rows/lanes contribute 0
    dc_new = (1.0 - alpha) * dc + alpha * counts
    return out, dc_new


def _reference(x, duty_cycle, *, alpha=ALPHA, beta=BETA, act_sparsity=ACT_SPARSITY):
    """Pure-JAX reference mirroring the PyTorch forward (training mode)."""
    n, f = x.shape
    k = math.floor((1.0 - act_sparsity) * f)
    target = k / f
    boost = jnp.exp(beta * (target - duty_cycle))
    boosted = x * boost
    _, idx = lax.top_k(boosted, k)
    rows = jnp.arange(n)[:, None]
    out = jnp.zeros_like(x).at[rows, idx].set(x[rows, idx])
    dc_new = (1.0 - alpha) * duty_cycle + alpha * jnp.sum(out > 0, axis=0).astype(jnp.float32)
    return out, dc_new


if __name__ == "__main__":
    key = jax.random.PRNGKey(0)
    k1, k2, k3, k4 = jax.random.split(key, 4)

    # Case 1: small (N, F), F not a multiple of 128 (exercises lane padding).
    n, f = 16, 32
    x = jax.random.normal(k1, (n, f), dtype=jnp.float32)
    dc0 = jnp.zeros((f,), dtype=jnp.float32)
    out, dc1 = activation_sparsity(x, dc0)
    jax.block_until_ready((out, dc1))
    ref_out, ref_dc1 = _reference(x, dc0)
    assert jnp.array_equal(out, ref_out), "case1: output mismatch"
    assert jnp.allclose(dc1, ref_dc1, atol=1e-5), "case1: duty-cycle mismatch"

    # Case 2: chained step with a non-trivial duty cycle (exercises boosting).
    x2 = jax.random.normal(k2, (n, f), dtype=jnp.float32)
    out2, dc2 = activation_sparsity(x2, dc1)
    ref_out2, ref_dc2 = _reference(x2, dc1)
    assert jnp.array_equal(out2, ref_out2), "case2: output mismatch"
    assert jnp.allclose(dc2, ref_dc2, atol=1e-5), "case2: duty-cycle mismatch"

    # Case 3: multi-tile grid + row/col padding + per-feature boost.
    n3, f3 = 21, 40
    x3 = jax.random.normal(k3, (n3, f3), dtype=jnp.float32)
    dc3 = jax.random.uniform(k4, (f3,), dtype=jnp.float32)
    out3, dc3n = activation_sparsity(x3, dc3, block_rows=8, sub_rows=8)
    ref_out3, ref_dc3n = _reference(x3, dc3)
    assert jnp.array_equal(out3, ref_out3), "case3: output mismatch"
    assert jnp.allclose(dc3n, ref_dc3n, atol=1e-5), "case3: duty-cycle mismatch"

    # Case 4: all boosted values equal -> ties straddle k; the kernel keeps the
    # lowest-column winners (lax.top_k order).  Checked against a hand-built
    # expectation so the test does not depend on unspecified tie order.
    n4, f4 = 5, 32
    kk = math.floor((1.0 - ACT_SPARSITY) * f4)
    x4 = jnp.ones((n4, f4), dtype=jnp.float32)
    dc4 = jnp.zeros((f4,), dtype=jnp.float32)
    out4, dc4n = activation_sparsity(x4, dc4)
    exp_out4 = (jnp.where(jnp.arange(f4)[None, :] < kk, 1.0, 0.0)
                * jnp.ones((n4, 1), jnp.float32))
    exp_dc4 = ALPHA * jnp.where(jnp.arange(f4) < kk, float(n4), 0.0)
    assert jnp.array_equal(out4, exp_out4.astype(out4.dtype)), "case4: tie output mismatch"
    assert jnp.allclose(dc4n, exp_dc4, atol=1e-5), "case4: tie duty-cycle mismatch"

    # TODO(synk): tie-breaking among exactly-equal boosted values keeps the
    # lowest column indices (lax.top_k order); torch.topk's tie order is
    # unspecified, so the kept set can differ only when ties straddle k.

    print("KERNEL_OK")
</pallas_src>

<mosaic_0001>
module attributes {stable_mosaic.version = 11 : i64} {
  func.func @_ksparse_kernel(%arg0: i32, %arg1: memref<32x128xf32, #tpu.memory_space<vmem>>, %arg2: memref<1x128xf32, #tpu.memory_space<vmem>>, %arg3: memref<32x128xf32, #tpu.memory_space<vmem>>, %arg4: memref<1x1x128xf32, #tpu.memory_space<vmem>>) attributes {dimension_semantics = [#tpu.dimension_semantics<parallel>], iteration_bounds = array<i64: 1>, scalar_prefetch = 0 : i64, scratch_operands = 0 : i64, tpu.core_type = #tpu.core_type<tc>, window_params = [{transform_indices = @transform_0, window_bounds = array<i64: 32, 128>}, {pipeline_mode = #tpu.pipeline_mode<synchronous>, transform_indices = @transform_1, window_bounds = array<i64: 1, 128>}, {transform_indices = @transform_2, window_bounds = array<i64: 32, 128>}, {transform_indices = @transform_3, window_bounds = array<i64: 1, 1, 128>}]} {
    %c0 = arith.constant 0 : index
    %c0_0 = arith.constant 0 : index
    %0 = vector.load %arg2[%c0, %c0_0] : memref<1x128xf32, #tpu.memory_space<vmem>>, vector<1x128xf32>
    %cst = arith.constant 1.000000e+00 : bf16
    %1 = vector.broadcast %cst : bf16 to vector<128x128xbf16>
    %2 = tpu.iota {dimensions = array<i32: 1>} : vector<32x128xi32>
    %c32_i32 = arith.constant 32 : i32
    %3 = vector.broadcast %c32_i32 : i32 to vector<32x128xi32>
    %4 = arith.cmpi slt, %2, %3 : vector<32x128xi32>
    %cst_1 = arith.constant 0.000000e+00 : f32
    %5 = vector.broadcast %cst_1 : f32 to vector<1x1x128xf32>
    %c0_2 = arith.constant 0 : index
    %c0_3 = arith.constant 0 : index
    %c0_4 = arith.constant 0 : index
    %6 = vector.load %arg4[%c0_2, %c0_3, %c0_4] : memref<1x1x128xf32, #tpu.memory_space<vmem>>, vector<1x1x128xf32>
    tpu.vector_store %arg4[%c0_2, %c0_3, %c0_4], %5 {strides = array<i32>} : memref<1x1x128xf32, #tpu.memory_space<vmem>>, vector<1x1x128xf32>,
    %c0_i32 = arith.constant 0 : i32
    %c1_i32 = arith.constant 1 : i32
    %7 = arith.muli %c0_i32, %c1_i32 : i32
    %c0_i32_5 = arith.constant 0 : i32
    %8 = arith.addi %c0_i32_5, %7 : i32
    %c32_i32_6 = arith.constant 32 : i32
    %9 = arith.muli %8, %c32_i32_6 : i32
    %10 = tpu.assume_multiple %9, 32 : i32
    %11 = arith.index_cast %10 : i32 to index
    %c0_7 = arith.constant 0 : index
    %12 = vector.load %arg1[%11, %c0_7] : memref<32x128xf32, #tpu.memory_space<vmem>>, vector<32x128xf32>
    %13 = vector.broadcast %0 : vector<1x128xf32> to vector<32x128xf32>
    %14 = arith.mulf %12, %13 : vector<32x128xf32>
    %15 = tpu.bitcast %14 : vector<32x128xf32> -> vector<32x128xi32>
    %c0_i32_8 = arith.constant 0 : i32
    %16 = vector.broadcast %c0_i32_8 : i32 to vector<32x128xi32>
    %17 = arith.cmpi slt, %15, %16 : vector<32x128xi32>
    %c2147483647_i32 = arith.constant 2147483647 : i32
    %18 = vector.broadcast %c2147483647_i32 : i32 to vector<32x128xi32>
    %19 = arith.xori %15, %18 : vector<32x128xi32>
    %20 = arith.select %17, %19, %15 : vector<32x128xi1>, vector<32x128xi32>
    %c-2147483648_i32 = arith.constant -2147483648 : i32
    %21 = vector.broadcast %c-2147483648_i32 : i32 to vector<32x128xi32>
    %22 = arith.select %4, %20, %21 : vector<32x128xi1>, vector<32x128xi32>
    %c0_i32_9 = arith.constant 0 : i32
    %23 = vector.broadcast %c0_i32_9 : i32 to vector<32x128xi32>
    %24 = arith.cmpi sge, %22, %23 : vector<32x128xi32>
    %25 = arith.extui %24 : vector<32x128xi1> to vector<32x128xi32>
    %26 = arith.sitofp %25 : vector<32x128xi32> to vector<32x128xf32>
    %27 = arith.truncf %26 : vector<32x128xf32> to vector<32x128xbf16>
    %cst_10 = arith.constant dense<0.000000e+00> : vector<32x128xf32>
    %28 = tpu.matmul %27, %1, %cst_10 {dimension_numbers = #tpu.dot_dimension_numbers<[1], [0], [0], [1], [0, 0, 1, 1], [], []>} : vector<32x128xbf16>, vector<128x128xbf16>, vector<32x128xf32> -> vector<32x128xf32>
    %29 = vector.extract_strided_slice %28 {offsets = [0, 0], sizes = [32, 1], strides = [1, 1]} : vector<32x128xf32> to vector<32x1xf32>
    %cst_11 = arith.constant 1.100000e+01 : f32
    %30 = vector.broadcast %cst_11 : f32 to vector<32x1xf32>
    %31 = arith.cmpf olt, %29, %30 : vector<32x1xf32>
    %c-2147483648_i32_12 = arith.constant -2147483648 : i32
    %c0_i32_13 = arith.constant 0 : i32
    %32 = vector.broadcast %c-2147483648_i32_12 : i32 to vector<32x1xi32>
    %33 = vector.broadcast %c0_i32_13 : i32 to vector<32x1xi32>
    %34 = arith.select %31, %32, %33 : vector<32x1xi1>, vector<32x1xi32>
    %cst_14 = arith.constant 1.280000e+02 : f32
    %35 = vector.broadcast %cst_14 : f32 to vector<32x1xf32>
    %36 = arith.select %31, %35, %29 : vector<32x1xi1>, vector<32x1xf32>
    %cst_15 = arith.constant dense<0xFF800000> : vector<1xf32>
    %37 = vector.multi_reduction <maximumf>, %36, %cst_15 [0] : vector<32x1xf32> to vector<1xf32>
    %38 = vector.shape_cast %37 : vector<1xf32> to vector<1x1xf32>
    %39 = vector.extract %38[0, 0] : f32 from vector<1x1xf32>
    %cst_16 = arith.constant 1.100000e+01 : f32
    %40 = arith.cmpf ogt, %39, %cst_16 : f32
    %c1073741824_i32 = arith.constant 1073741824 : i32
    %41:4 = scf.while (%arg5 = %c1073741824_i32, %arg6 = %34, %arg7 = %36, %arg8 = %40) : (i32, vector<32x1xi32>, vector<32x1xf32>, i1) -> (i32, vector<32x1xi32>, vector<32x1xf32>, i1) {
      %c0_i32_37 = arith.constant 0 : i32
      %83 = arith.cmpi sgt, %arg5, %c0_i32_37 : i32
      %84 = arith.andi %83, %arg8 : i1
      scf.condition(%84) %arg5, %arg6, %arg7, %arg8 : i32, vector<32x1xi32>, vector<32x1xf32>, i1
    } do {
    ^bb0(%arg5: i32, %arg6: vector<32x1xi32>, %arg7: vector<32x1xf32>, %arg8: i1):
      %83 = vector.broadcast %arg5 : i32 to vector<32x1xi32>
      %84 = arith.addi %arg6, %83 : vector<32x1xi32>
      %85 = vector.broadcast %84 : vector<32x1xi32> to vector<32x128xi32>
      %86 = arith.cmpi sge, %22, %85 : vector<32x128xi32>
      %87 = arith.extui %86 : vector<32x128xi1> to vector<32x128xi32>
      %88 = arith.sitofp %87 : vector<32x128xi32> to vector<32x128xf32>
      %89 = arith.truncf %88 : vector<32x128xf32> to vector<32x128xbf16>
      %cst_37 = arith.constant dense<0.000000e+00> : vector<32x128xf32>
      %90 = tpu.matmul %89, %1, %cst_37 {dimension_numbers = #tpu.dot_dimension_numbers<[1], [0], [0], [1], [0, 0, 1, 1], [], []>} : vector<32x128xbf16>, vector<128x128xbf16>, vector<32x128xf32> -> vector<32x128xf32>
      %91 = vector.extract_strided_slice %90 {offsets = [0, 0], sizes = [32, 1], strides = [1, 1]} : vector<32x128xf32> to vector<32x1xf32>
      %cst_38 = arith.constant 1.100000e+01 : f32
      %92 = vector.broadcast %cst_38 : f32 to vector<32x1xf32>
      %93 = arith.cmpf oge, %91, %92 : vector<32x1xf32>
      %94 = arith.select %93, %84, %arg6 : vector<32x1xi1>, vector<32x1xi32>
      %95 = arith.select %93, %91, %arg7 : vector<32x1xi1>, vector<32x1xf32>
      %c1_i32_39 = arith.constant 1 : i32
      %96 = arith.shrsi %arg5, %c1_i32_39 : i32
      %cst_40 = arith.constant dense<0xFF800000> : vector<1xf32>
      %97 = vector.multi_reduction <maximumf>, %95, %cst_40 [0] : vector<32x1xf32> to vector<1xf32>
      %98 = vector.shape_cast %97 : vector<1xf32> to vector<1x1xf32>
      %99 = vector.extract %98[0, 0] : f32 from vector<1x1xf32>
      %cst_41 = arith.constant 1.100000e+01 : f32
      %100 = arith.cmpf ogt, %99, %cst_41 : f32
      scf.yield %96, %94, %95, %100 : i32, vector<32x1xi32>, vector<32x1xf32>, i1
    }
    %42 = vector.broadcast %41#1 : vector<32x1xi32> to vector<32x128xi32>
    %43 = arith.cmpi sgt, %22, %42 : vector<32x128xi32>
    %44 = arith.extui %43 : vector<32x128xi1> to vector<32x128xi32>
    %45 = arith.sitofp %44 : vector<32x128xi32> to vector<32x128xf32>
    %46 = arith.truncf %45 : vector<32x128xf32> to vector<32x128xbf16>
    %cst_17 = arith.constant dense<0.000000e+00> : vector<32x128xf32>
    %47 = tpu.matmul %46, %1, %cst_17 {dimension_numbers = #tpu.dot_dimension_numbers<[1], [0], [0], [1], [0, 0, 1, 1], [], []>} : vector<32x128xbf16>, vector<128x128xbf16>, vector<32x128xf32> -> vector<32x128xf32>
    %48 = vector.extract_strided_slice %47 {offsets = [0, 0], sizes = [32, 1], strides = [1, 1]} : vector<32x128xf32> to vector<32x1xf32>
    %49 = vector.broadcast %41#1 : vector<32x1xi32> to vector<32x128xi32>
    %50 = arith.cmpi eq, %22, %49 : vector<32x128xi32>
    %51 = arith.subf %41#2, %48 : vector<32x1xf32>
    %cst_18 = arith.constant 1.100000e+01 : f32
    %52 = vector.broadcast %cst_18 : f32 to vector<32x1xf32>
    %53 = arith.subf %52, %48 : vector<32x1xf32>
    %54 = arith.subf %51, %53 : vector<32x1xf32>
    %cst_19 = arith.constant dense<0xFF800000> : vector<1xf32>
    %55 = vector.multi_reduction <maximumf>, %54, %cst_19 [0] : vector<32x1xf32> to vector<1xf32>
    %56 = vector.shape_cast %55 : vector<1xf32> to vector<1x1xf32>
    %57 = vector.extract %56[0, 0] : f32 from vector<1x1xf32>
    %cst_20 = arith.constant 5.000000e-01 : f32
    %58 = arith.cmpf ogt, %57, %cst_20 : f32
    %59 = arith.extui %58 : i1 to i32
    %c0_i32_21 = arith.constant 0 : i32
    %60 = arith.cmpi ne, %59, %c0_i32_21 : i32
    %61 = scf.if %60 -> (vector<32x128xf32>) {
      %83 = tpu.iota {dimensions = array<i32: 1>} : vector<32x128xi32>
      %c128_i32 = arith.constant 128 : i32
      %84 = vector.broadcast %c128_i32 : i32 to vector<32x128xi32>
      %85 = arith.subi %84, %83 : vector<32x128xi32>
      %c0_i32_37 = arith.constant 0 : i32
      %86 = vector.broadcast %c0_i32_37 : i32 to vector<32x128xi32>
      %87 = arith.select %50, %85, %86 : vector<32x128xi1>, vector<32x128xi32>
      %c0_i32_38 = arith.constant 0 : i32
      %88 = vector.broadcast %c0_i32_38 : i32 to vector<32x1xi32>
      %c128_i32_39 = arith.constant 128 : i32
      %89 = vector.broadcast %c128_i32_39 : i32 to vector<32x1xi32>
      %90 = arith.addi %88, %89 : vector<32x1xi32>
      %91 = vector.broadcast %90 : vector<32x1xi32> to vector<32x128xi32>
      %92 = arith.cmpi sge, %87, %91 : vector<32x128xi32>
      %93 = arith.extui %92 : vector<32x128xi1> to vector<32x128xi32>
      %94 = arith.sitofp %93 : vector<32x128xi32> to vector<32x128xf32>
      %95 = arith.truncf %94 : vector<32x128xf32> to vector<32x128xbf16>
      %cst_40 = arith.constant dense<0.000000e+00> : vector<32x128xf32>
      %96 = tpu.matmul %95, %1, %cst_40 {dimension_numbers = #tpu.dot_dimension_numbers<[1], [0], [0], [1], [0, 0, 1, 1], [], []>} : vector<32x128xbf16>, vector<128x128xbf16>, vector<32x128xf32> -> vector<32x128xf32>
      %97 = vector.extract_strided_slice %96 {offsets = [0, 0], sizes = [32, 1], strides = [1, 1]} : vector<32x128xf32> to vector<32x1xf32>
      %98 = arith.cmpf oge, %97, %53 : vector<32x1xf32>
      %99 = arith.select %98, %90, %88 : vector<32x1xi1>, vector<32x1xi32>
      %c64_i32 = arith.constant 64 : i32
      %100 = vector.broadcast %c64_i32 : i32 to vector<32x1xi32>
      %101 = arith.addi %99, %100 : vector<32x1xi32>
      %102 = vector.broadcast %101 : vector<32x1xi32> to vector<32x128xi32>
      %103 = arith.cmpi sge, %87, %102 : vector<32x128xi32>
      %104 = arith.extui %103 : vector<32x128xi1> to vector<32x128xi32>
      %105 = arith.sitofp %104 : vector<32x128xi32> to vector<32x128xf32>
      %106 = arith.truncf %105 : vector<32x128xf32> to vector<32x128xbf16>
      %cst_41 = arith.constant dense<0.000000e+00> : vector<32x128xf32>
      %107 = tpu.matmul %106, %1, %cst_41 {dimension_numbers = #tpu.dot_dimension_numbers<[1], [0], [0], [1], [0, 0, 1, 1], [], []>} : vector<32x128xbf16>, vector<128x128xbf16>, vector<32x128xf32> -> vector<32x128xf32>
      %108 = vector.extract_strided_slice %107 {offsets = [0, 0], sizes = [32, 1], strides = [1, 1]} : vector<32x128xf32> to vector<32x1xf32>
      %109 = arith.cmpf oge, %108, %53 : vector<32x1xf32>
      %110 = arith.select %109, %101, %99 : vector<32x1xi1>, vector<32x1xi32>
      %c32_i32_42 = arith.constant 32 : i32
      %111 = vector.broadcast %c32_i32_42 : i32 to vector<32x1xi32>
      %112 = arith.addi %110, %111 : vector<32x1xi32>
      %113 = vector.broadcast %112 : vector<32x1xi32> to vector<32x128xi32>
      %114 = arith.cmpi sge, %87, %113 : vector<32x128xi32>
      %115 = arith.extui %114 : vector<32x128xi1> to vector<32x128xi32>
      %116 = arith.sitofp %115 : vector<32x128xi32> to vector<32x128xf32>
      %117 = arith.truncf %116 : vector<32x128xf32> to vector<32x128xbf16>
      %cst_43 = arith.constant dense<0.000000e+00> : vector<32x128xf32>
      %118 = tpu.matmul %117, %1, %cst_43 {dimension_numbers = #tpu.dot_dimension_numbers<[1], [0], [0], [1], [0, 0, 1, 1], [], []>} : vector<32x128xbf16>, vector<128x128xbf16>, vector<32x128xf32> -> vector<32x128xf32>
      %119 = vector.extract_strided_slice %118 {offsets = [0, 0], sizes = [32, 1], strides = [1, 1]} : vector<32x128xf32> to vector<32x1xf32>
      %120 = arith.cmpf oge, %119, %53 : vector<32x1xf32>
      %121 = arith.select %120, %112, %110 : vector<32x1xi1>, vector<32x1xi32>
      %c16_i32 = arith.constant 16 : i32
      %122 = vector.broadcast %c16_i32 : i32 to vector<32x1xi32>
      %123 = arith.addi %121, %122 : vector<32x1xi32>
      %124 = vector.broadcast %123 : vector<32x1xi32> to vector<32x128xi32>
      %125 = arith.cmpi sge, %87, %124 : vector<32x128xi32>
      %126 = arith.extui %125 : vector<32x128xi1> to vector<32x128xi32>
      %127 = arith.sitofp %126 : vector<32x128xi32> to vector<32x128xf32>
      %128 = arith.truncf %127 : vector<32x128xf32> to vector<32x128xbf16>
      %cst_44 = arith.constant dense<0.000000e+00> : vector<32x128xf32>
      %129 = tpu.matmul %128, %1, %cst_44 {dimension_numbers = #tpu.dot_dimension_numbers<[1], [0], [0], [1], [0, 0, 1, 1], [], []>} : vector<32x128xbf16>, vector<128x128xbf16>, vector<32x128xf32> -> vector<32x128xf32>
      %130 = vector.extract_strided_slice %129 {offsets = [0, 0], sizes = [32, 1], strides = [1, 1]} : vector<32x128xf32> to vector<32x1xf32>
      %131 = arith.cmpf oge, %130, %53 : vector<32x1xf32>
      %132 = arith.select %131, %123, %121 : vector<32x1xi1>, vector<32x1xi32>
      %c8_i32 = arith.constant 8 : i32
      %133 = vector.broadcast %c8_i32 : i32 to vector<32x1xi32>
      %134 = arith.addi %132, %133 : vector<32x1xi32>
      %135 = vector.broadcast %134 : vector<32x1xi32> to vector<32x128xi32>
      %136 = arith.cmpi sge, %87, %135 : vector<32x128xi32>
      %137 = arith.extui %136 : vector<32x128xi1> to vector<32x128xi32>
      %138 = arith.sitofp %137 : vector<32x128xi32> to vector<32x128xf32>
      %139 = arith.truncf %138 : vector<32x128xf32> to vector<32x128xbf16>
      %cst_45 = arith.constant dense<0.000000e+00> : vector<32x128xf32>
      %140 = tpu.matmul %139, %1, %cst_45 {dimension_numbers = #tpu.dot_dimension_numbers<[1], [0], [0], [1], [0, 0, 1, 1], [], []>} : vector<32x128xbf16>, vector<128x128xbf16>, vector<32x128xf32> -> vector<32x128xf32>
      %141 = vector.extract_strided_slice %140 {offsets = [0, 0], sizes = [32, 1], strides = [1, 1]} : vector<32x128xf32> to vector<32x1xf32>
      %142 = arith.cmpf oge, %141, %53 : vector<32x1xf32>
      %143 = arith.select %142, %134, %132 : vector<32x1xi1>, vector<32x1xi32>
      %c4_i32 = arith.constant 4 : i32
      %144 = vector.broadcast %c4_i32 : i32 to vector<32x1xi32>
      %145 = arith.addi %143, %144 : vector<32x1xi32>
      %146 = vector.broadcast %145 : vector<32x1xi32> to vector<32x128xi32>
      %147 = arith.cmpi sge, %87, %146 : vector<32x128xi32>
      %148 = arith.extui %147 : vector<32x128xi1> to vector<32x128xi32>
      %149 = arith.sitofp %148 : vector<32x128xi32> to vector<32x128xf32>
      %150 = arith.truncf %149 : vector<32x128xf32> to vector<32x128xbf16>
      %cst_46 = arith.constant dense<0.000000e+00> : vector<32x128xf32>
      %151 = tpu.matmul %150, %1, %cst_46 {dimension_numbers = #tpu.dot_dimension_numbers<[1], [0], [0], [1], [0, 0, 1, 1], [], []>} : vector<32x128xbf16>, vector<128x128xbf16>, vector<32x128xf32> -> vector<32x128xf32>
      %152 = vector.extract_strided_slice %151 {offsets = [0, 0], sizes = [32, 1], strides = [1, 1]} : vector<32x128xf32> to vector<32x1xf32>
      %153 = arith.cmpf oge, %152, %53 : vector<32x1xf32>
      %154 = arith.select %153, %145, %143 : vector<32x1xi1>, vector<32x1xi32>
      %c2_i32 = arith.constant 2 : i32
      %155 = vector.broadcast %c2_i32 : i32 to vector<32x1xi32>
      %156 = arith.addi %154, %155 : vector<32x1xi32>
      %157 = vector.broadcast %156 : vector<32x1xi32> to vector<32x128xi32>
      %158 = arith.cmpi sge, %87, %157 : vector<32x128xi32>
      %159 = arith.extui %158 : vector<32x128xi1> to vector<32x128xi32>
      %160 = arith.sitofp %159 : vector<32x128xi32> to vector<32x128xf32>
      %161 = arith.truncf %160 : vector<32x128xf32> to vector<32x128xbf16>
      %cst_47 = arith.constant dense<0.000000e+00> : vector<32x128xf32>
      %162 = tpu.matmul %161, %1, %cst_47 {dimension_numbers = #tpu.dot_dimension_numbers<[1], [0], [0], [1], [0, 0, 1, 1], [], []>} : vector<32x128xbf16>, vector<128x128xbf16>, vector<32x128xf32> -> vector<32x128xf32>
      %163 = vector.extract_strided_slice %162 {offsets = [0, 0], sizes = [32, 1], strides = [1, 1]} : vector<32x128xf32> to vector<32x1xf32>
      %164 = arith.cmpf oge, %163, %53 : vector<32x1xf32>
      %165 = arith.select %164, %156, %154 : vector<32x1xi1>, vector<32x1xi32>
      %c1_i32_48 = arith.constant 1 : i32
      %166 = vector.broadcast %c1_i32_48 : i32 to vector<32x1xi32>
      %167 = arith.addi %165, %166 : vector<32x1xi32>
      %168 = vector.broadcast %167 : vector<32x1xi32> to vector<32x128xi32>
      %169 = arith.cmpi sge, %87, %168 : vector<32x128xi32>
      %170 = arith.extui %169 : vector<32x128xi1> to vector<32x128xi32>
      %171 = arith.sitofp %170 : vector<32x128xi32> to vector<32x128xf32>
      %172 = arith.truncf %171 : vector<32x128xf32> to vector<32x128xbf16>
      %cst_49 = arith.constant dense<0.000000e+00> : vector<32x128xf32>
      %173 = tpu.matmul %172, %1, %cst_49 {dimension_numbers = #tpu.dot_dimension_numbers<[1], [0], [0], [1], [0, 0, 1, 1], [], []>} : vector<32x128xbf16>, vector<128x128xbf16>, vector<32x128xf32> -> vector<32x128xf32>
      %174 = vector.extract_strided_slice %173 {offsets = [0, 0], sizes = [32, 1], strides = [1, 1]} : vector<32x128xf32> to vector<32x1xf32>
      %175 = arith.cmpf oge, %174, %53 : vector<32x1xf32>
      %176 = arith.select %175, %167, %165 : vector<32x1xi1>, vector<32x1xi32>
      %177 = vector.broadcast %176 : vector<32x1xi32> to vector<32x128xi32>
      %178 = arith.cmpi sge, %87, %177 : vector<32x128xi32>
      %179 = arith.ori %43, %178 : vector<32x128xi1>
      %cst_50 = arith.constant 1.000000e+00 : f32
      %cst_51 = arith.constant 0.000000e+00 : f32
      %180 = vector.broadcast %cst_50 : f32 to vector<32x128xf32>
      %181 = vector.broadcast %cst_51 : f32 to vector<32x128xf32>
      %182 = arith.select %179, %180, %181 : vector<32x128xi1>, vector<32x128xf32>
      scf.yield %182 : vector<32x128xf32>
    } else {
      %83 = arith.ori %43, %50 : vector<32x128xi1>
      %cst_37 = arith.constant 1.000000e+00 : f32
      %cst_38 = arith.constant 0.000000e+00 : f32
      %84 = vector.broadcast %cst_37 : f32 to vector<32x128xf32>
      %85 = vector.broadcast %cst_38 : f32 to vector<32x128xf32>
      %86 = arith.select %83, %84, %85 : vector<32x128xi1>, vector<32x128xf32>
      scf.yield %86 : vector<32x128xf32>
    }
    %62 = arith.index_cast %10 : i32 to index
    %c0_22 = arith.constant 0 : index
    %63 = vector.load %arg1[%62, %c0_22] : memref<32x128xf32, #tpu.memory_space<vmem>>, vector<32x128xf32>
    %cst_23 = arith.constant 0.000000e+00 : f32
    %64 = vector.broadcast %cst_23 : f32 to vector<32x128xf32>
    %65 = arith.cmpf ogt, %61, %64 : vector<32x128xf32>
    %c0_i32_24 = arith.constant 0 : i32
    %66 = arith.sitofp %c0_i32_24 : i32 to f32
    %67 = vector.broadcast %66 : f32 to vector<32x128xf32>
    %68 = arith.select %65, %63, %67 : vector<32x128xi1>, vector<32x128xf32>
    %69 = arith.index_cast %10 : i32 to index
    %c0_25 = arith.constant 0 : index
    %70 = vector.load %arg3[%69, %c0_25] : memref<32x128xf32, #tpu.memory_space<vmem>>, vector<32x128xf32>
    tpu.vector_store %arg3[%69, %c0_25], %68 {strides = array<i32>} : memref<32x128xf32, #tpu.memory_space<vmem>>, vector<32x128xf32>,
    %cst_26 = arith.constant 0.000000e+00 : f32
    %71 = vector.broadcast %cst_26 : f32 to vector<32x128xf32>
    %72 = arith.cmpf ogt, %63, %71 : vector<32x128xf32>
    %73 = arith.andi %65, %72 : vector<32x128xi1>
    %cst_27 = arith.constant 1.000000e+00 : f32
    %cst_28 = arith.constant 0.000000e+00 : f32
    %74 = vector.broadcast %cst_27 : f32 to vector<32x128xf32>
    %75 = vector.broadcast %cst_28 : f32 to vector<32x128xf32>
    %76 = arith.select %73, %74, %75 : vector<32x128xi1>, vector<32x128xf32>
    %c0_29 = arith.constant 0 : index
    %c0_30 = arith.constant 0 : index
    %c0_31 = arith.constant 0 : index
    %77 = vector.load %arg4[%c0_29, %c0_30, %c0_31] : memref<1x1x128xf32, #tpu.memory_space<vmem>>, vector<1x1x128xf32>
    %cst_32 = arith.constant dense<0.000000e+00> : vector<128xf32>
    %78 = vector.multi_reduction <add>, %76, %cst_32 [0] : vector<32x128xf32> to vector<128xf32>
    %79 = vector.shape_cast %78 : vector<128xf32> to vector<1x128xf32>
    %80 = vector.shape_cast %79 : vector<1x128xf32> to vector<1x1x128xf32>
    %81 = arith.addf %77, %80 : vector<1x1x128xf32>
    %c0_33 = arith.constant 0 : index
    %c0_34 = arith.constant 0 : index
    %c0_35 = arith.constant 0 : index
    %82 = vector.load %arg4[%c0_33, %c0_34, %c0_35] : memref<1x1x128xf32, #tpu.memory_space<vmem>>, vector<1x1x128xf32>
    tpu.vector_store %arg4[%c0_33, %c0_34, %c0_35], %81 {strides = array<i32>} : memref<1x1x128xf32, #tpu.memory_space<vmem>>, vector<1x1x128xf32>,
    %c1_i32_36 = arith.constant 1 : i32
    return
  }
  func.func @transform_0(%arg0: i32) -> (i32, i32) {
    %c0_i32 = arith.constant 0 : i32
    %c0_i32_0 = arith.constant 0 : i32
    return %arg0, %c0_i32 : i32, i32
  }
  func.func @transform_1(%arg0: i32) -> (i32, i32) {
    %c0_i32 = arith.constant 0 : i32
    %c0_i32_0 = arith.constant 0 : i32
    %c0_i32_1 = arith.constant 0 : i32
    return %c0_i32, %c0_i32_0 : i32, i32
  }
  func.func @transform_2(%arg0: i32) -> (i32, i32) {
    %c0_i32 = arith.constant 0 : i32
    %c0_i32_0 = arith.constant 0 : i32
    return %arg0, %c0_i32 : i32, i32
  }
  func.func @transform_3(%arg0: i32) -> (i32, i32, i32) {
    %c0_i32 = arith.constant 0 : i32
    %c0_i32_0 = arith.constant 0 : i32
    %c0_i32_1 = arith.constant 0 : i32
    return %arg0, %c0_i32, %c0_i32_0 : i32, i32, i32
  }
}

</mosaic_0001>

<bundles_post_ra>
// kernel: tpu_custom_call.1
= control target key start
LH: loop header
LB: loop body
LE: loop exit
PB: predicated region body
PF: predicated region fallthrough
CT: control target
= control target key end

     0   :  { %9 = vsyncpa [#allocation3], 0  ;;  %s2080_s0 = inlined_call_operand.hbm [shape: f32[32,128], index: 0, kind: input, shape index: {}]   ;;  %s2081_s1 = inlined_call_operand.hbm [shape: f32[1,128], index: 1, kind: input, shape index: {}]   ;;  %s2082_s2 = inlined_call_operand.hbm [shape: f32[32,128], index: 2, kind: output, shape index: {0}]   ;;  %s2083_s3 = inlined_call_operand.hbm [shape: f32[1,1,128], index: 3, kind: output, shape index: {1}]  }
   0x1   :  { %10 = vsyncpa [#allocation6], 0 }
   0x2   :  { %11 = vsyncpa [#allocation4], 0 }
   0x3   :  { %12 = vsyncpa [#allocation9], 0  ;;  %s17_s14 = sshll.u32 %s2080_s0, 4  ;;  %s1512_s15 = smov [#allocation2]   ;;  %s18_s14 = int_to_ptr.hbm [resolvable:$true] %s17_s14 }
   0x4   :  { %s19_s16 = sshll.u32 %s1512_s15, 4  ;;  %s31_s19 = sshll.u32 %s2081_s1, 4  ;;  %s20_s16 = int_to_ptr.vmem [resolvable:$true] %s19_s16  ;;  %s32_s19 = int_to_ptr.hbm [resolvable:$true] %s31_s19 }
   0x5   :  { %s1513_s20 = smov 128   ;;  %s1514_s21 = smov 8  }
   0x6   :  { %25 = dma.hbm_to_vmem [thread:$0]  %s18_s14, 512, %s20_s16, [#allocation3], %s1513_s20, %s1513_s20, %s1514_s21  }
   0x7   :  { %s1515_s22 = smov [#allocation5]  }
   0x8   :  { %s33_s23 = sshll.u32 %s1515_s22, 4  ;;  %s34_s23 = int_to_ptr.vmem [resolvable:$true] %s33_s23 }
   0x9   :  { %36 = dma.hbm_to_vmem [thread:$0]  %s32_s19, 16, %s34_s23, [#allocation6]  }
   0xa   :  { %1420 = dma.done.wait [#allocation3], 512  }
   0xb   :  { %1421 = vsyncadd [#allocation3], 4294966784 }
   0xc   :  { %1422 = dma.done.wait [#allocation6], 16  }
   0xd   :  { %1423 = vsyncadd [#allocation6], 4294967280  ;;  %v1516_v0 = vmov 1065369472   ;;  %v1517_v1 = vmov 0.0   ;;  %v1563_v2 = vld [vmem:[#allocation2] sm:$0xff]  ;;  %v47_v7 = vlaneseq }
   0xe   :  { %96 = vmatpush.bf16.msra.mxu0 %v1516_v0  ;;  %996 = vmatpush.bf16.msra.mxu1 %v1516_v0  ;;  %50 = vst [vmem:[#allocation8] sm:$0x1] %v1517_v1  ;;  %v1565_v3 = vld [vmem:[#allocation2 + $0x8] sm:$0xff]  ;;  %v1232_v4 = vld [vmem:[#allocation5] ss:$0 sm:$0xff]  ;;  %v1569_v5 = vld [vmem:[#allocation2 + $0x10] sm:$0xff] }
   0xf   :  { %v1571_v6 = vld [vmem:[#allocation2 + $0x18] sm:$0xff]  ;;  %v58_v8 = vmul.f32 %v1232_v4, %v1563_v2  ;;  %v59_v9 = vmul.f32 %v1232_v4, %v1565_v3  ;;  %v60_v10 = vmul.f32 %v1232_v4, %v1569_v5  ;;  %v1579_v12 = vand.u32 127, %v47_v7 }
  0x10   :  { %v61_v11 = vmul.f32 %v1232_v4, %v1571_v6  ;;  %v1518_v25 = vmov 1.0|1.0   ;;  %v1519_v28 = vmov 0   ;;  %vm127_vm13 = vcmask 7168  }
  0x11   :  { %v70_v13 = vxor.u32 2147483647, %v58_v8  ;;  %v71_v14 = vxor.u32 2147483647, %v59_v9  ;;  %vm66_vm0 = vcmp.lt.s32.totalorder %v58_v8, 0  ;;  %vm67_vm1 = vcmp.lt.s32.totalorder %v59_v9, 0 }
  0x12   :  { %97 = vmatpush.bf16.msra.mxu0 %v1516_v0  ;;  %997 = vmatpush.bf16.msra.mxu1 %v1516_v0  ;;  %v72_v15 = vxor.u32 2147483647, %v60_v10  ;;  %v73_v16 = vxor.u32 2147483647, %v61_v11  ;;  %vm68_vm2 = vcmp.lt.s32.totalorder %v60_v10, 0  ;;  %vm69_vm3 = vcmp.lt.s32.totalorder %v61_v11, 0 }
  0x13   :  { %vm49_vm4 = vcmp.lt.s32.totalorder %v1579_v12, 32  ;;  %v74_v17 = vsel %vm66_vm0, %v70_v13, %v58_v8  ;;  %v75_v18 = vsel %vm67_vm1, %v71_v14, %v59_v9 }
  0x14   :  { %v76_v19 = vsel %vm68_vm2, %v72_v15, %v60_v10  ;;  %v77_v20 = vsel %vm69_vm3, %v73_v16, %v61_v11  ;;  %v1586_v21 = vsel %vm49_vm4, %v74_v17, 2147483648  ;;  %v1588_v22 = vsel %vm49_vm4, %v75_v18, 2147483648 }
  0x15   :  { %v1590_v23 = vsel %vm49_vm4, %v76_v19, 2147483648  ;;  %v1592_v24 = vsel %vm49_vm4, %v77_v20, 2147483648  ;;  %vm82_vm5 = vcmp.ge.s32.totalorder %v1586_v21, 0  ;;  %vm83_vm6 = vcmp.ge.s32.totalorder %v1588_v22, 0 }
  0x16   :  { %98 = vmatpush.bf16.msra.mxu0 %v1516_v0  ;;  %998 = vmatpush.bf16.msra.mxu1 %v1516_v0  ;;  %vm84_vm7 = vcmp.ge.s32.totalorder %v1590_v23, 0  ;;  %vm85_vm8 = vcmp.ge.s32.totalorder %v1592_v24, 0  ;;  %vm911_vm9 = vmpackc.low %vm83_vm6, %vm82_vm5 }
  0x17   :  { %vm913_vm10 = vmpackc.low %vm85_vm8, %vm84_vm7 }
  0x1a   :  { %99 = vmatpush.bf16.msra.mxu0 %v1516_v0  ;;  %999 = vmatpush.bf16.msra.mxu1 %v1516_v0 }
  0x1e   :  { %100 = vmatpush.bf16.msra.mxu0 %v1516_v0  ;;  %1000 = vmatpush.bf16.msra.mxu1 %v1516_v0 }
  0x22   :  { %101 = vmatpush.bf16.msra.mxu0 %v1516_v0  ;;  %1001 = vmatpush.bf16.msra.mxu1 %v1516_v0 }
  0x26   :  { %102 = vmatpush.bf16.msra.mxu0 %v1516_v0  ;;  %1002 = vmatpush.bf16.msra.mxu1 %v1516_v0 }
  0x2a   :  { %103 = vmatpush.bf16.msra.mxu0 %v1516_v0  ;;  %1003 = vmatpush.bf16.msra.mxu1 %v1516_v0 }
  0x2d   :  { %912 = vmatmul.msk.bf16.vlgmr.msra.gmra.mxu0 %vm911_vm9, %v1518_v25  ;;  %914 = vmatmul.msk.bf16.vlgmr.msra.gmra.mxu1 %vm913_vm10, %v1518_v25 }
  0xaa   :  { %v105_v26 = vpop.f32.mrf.mxu0  ;;  %v110_v27 = vpop.f32.mrf.mxu1 }
  0xab   :  { %vm115_vm11 = vcmp.lt.f32.partialorder %v105_v26, 11.0  ;;  %vm117_vm12 = vcmp.lt.f32.partialorder %v110_v27, 11.0 }
  0xac   :  { %v119_v29 = vsel %vm115_vm11, 2147483648, %v1519_v28   ;;  %v121_v30 = vsel %vm117_vm12, 2147483648, %v1519_v28   ;;  %v123_v31 = vsel %vm115_vm11, 128.0, %v105_v26   ;;  %v125_v32 = vsel %vm117_vm12, 128.0, %v110_v27  }
  0xad   :  { %v128_v39 = vsel %vm127_vm13, %v123_v31, -inf  ;;  %v130_v40 = vsel %vm127_vm13, %v125_v32, -inf  ;;  %v2085_v53 = vmov %v125_v32  ;;  %v2087_v55 = vmov %v123_v31 }
  0xae   :  { %v2089_v57 = vmov %v121_v30  ;;  %v2091_v59 = vmov %v119_v29 }
  0xb2   :  { %v107_v33 = vpop.f32.mrf.mxu0  ;;  %v112_v34 = vpop.f32.mrf.mxu1 }
  0xb3   :  { %vm116_vm14 = vcmp.lt.f32.partialorder %v107_v33, 11.0  ;;  %vm118_vm15 = vcmp.lt.f32.partialorder %v112_v34, 11.0 }
  0xb4   :  { %v120_v35 = vsel %vm116_vm14, 2147483648, %v1519_v28   ;;  %v124_v36 = vsel %vm116_vm14, 128.0, %v107_v33   ;;  %v122_v37 = vsel %vm118_vm15, 2147483648, %v1519_v28   ;;  %v126_v38 = vsel %vm118_vm15, 128.0, %v112_v34  }
  0xb5   :  { %v129_v41 = vsel %vm127_vm13, %v124_v36, -inf  ;;  %v131_v42 = vsel %vm127_vm13, %v126_v38, -inf  ;;  %v2084_v52 = vmov %v126_v38  ;;  %v2086_v54 = vmov %v124_v36 }
  0xb6   :  { %v132_v43 = vmax.f32 %v128_v39, %v129_v41  ;;  %v133_v44 = vmax.f32 %v130_v40, %v131_v42  ;;  %v2088_v56 = vmov %v122_v37  ;;  %v2090_v58 = vmov %v120_v35 }
  0xb8   :  { %v134_v45 = vmax.f32 %v132_v43, %v133_v44 }
  0xba   :  { %v135_v46 = vrot.slane %v134_v45, 4 }
  0xbc   :  { %v136_v47 = vmax.f32 %v134_v45, %v135_v46 }
  0xbe   :  { %v137_v48 = vrot.slane %v136_v47, 2 }
  0xc0   :  { %v138_v49 = vmax.f32 %v136_v47, %v137_v48 }
  0xc2   :  { %v139_v50 = vrot.slane %v138_v49, 1 }
  0xc4   :  { %v140_v51 = vmax.f32 %v138_v49, %v139_v50 }
  0xc6   :  { %1020 = vpush %v140_v51 }
  0xf7   :  { %s1021_s0 = spop %1020 }
  0xf8   :  { %p142_p0 = scmp.gt.f32.partialorder %s1021_s0, 11.0 }
  0xf9   :  { %s1644_s1 = smov (%p142_p0), 1073741824  }
  0xfa   :  { %888 = sbr.rel (!%p142_p0) target bundleno = 596 (0x254), region = 53 }
  0xff LB: > { %v1520_v60 = vmov 0   ;;  %v159_v61 = vstv %s1462_s1  ;;  %s221_s24 = sshra.s32 %s1462_s1, 1   ;;  %v1521_v4 = vmov 1065369472   ;;  %v1522_v14 = vmov 1.0|1.0   ;;  %s1462_s1 = sphi %s1644_s1, %s2100_s1   ;;  %v1458_v29 = vphi %v119_v29, %v2099_v29   ;;  %v1454_v35 = vphi %v120_v35, %v2098_v35   ;;  %v1450_v30 = vphi %v121_v30, %v2097_v30   ;;  %v1446_v37 = vphi %v122_v37, %v2096_v37   ;;  %v1442_v31 = vphi %v123_v31, %v2095_v31   ;;  %v1438_v36 = vphi %v124_v36, %v2094_v36   ;;  %v1434_v32 = vphi %v125_v32, %v2093_v32   ;;  %v1430_v38 = vphi %v126_v38, %v2092_v38  }
 0x100   : > { %1234 = vset.pattern.permute.xlu1 %v1520_v60  ;;  %1233 = vset.pattern.permute.xlu0 %v1520_v60  ;;  %v160_v62 = vadd.s32 %v1458_v29, %v159_v61  ;;  %v162_v63 = vadd.s32 %v1450_v30, %v159_v61  ;;  %v161_v7 = vadd.s32 %v1454_v35, %v159_v61  ;;  %p154_p2 = scmp.gt.s32.totalorder %s221_s24, 0  ;;  %s2100_s1 = smov %s221_s24 }
 0x101   : > { %190 = vmatpush.bf16.msra.mxu0 %v1521_v4  ;;  %1004 = vmatpush.bf16.msra.mxu1 %v1521_v4  ;;  %v163_v8 = vadd.s32 %v1446_v37, %v159_v61 }
 0x102   : > { %165 = vperm.xlu0 %1233, %v160_v62   ;;  %171 = vperm.xlu1 %1234, %v162_v63  }
 0x105   : > { %191 = vmatpush.bf16.msra.mxu0 %v1521_v4  ;;  %1005 = vmatpush.bf16.msra.mxu1 %v1521_v4 }
 0x109   : > { %192 = vmatpush.bf16.msra.mxu0 %v1521_v4  ;;  %1006 = vmatpush.bf16.msra.mxu1 %v1521_v4 }
 0x10a   : > { %168 = vperm.xlu0 %1233, %v161_v7   ;;  %174 = vperm.xlu1 %1234, %v163_v8  }
 0x10d   : > { %193 = vmatpush.bf16.msra.mxu0 %v1521_v4  ;;  %1007 = vmatpush.bf16.msra.mxu1 %v1521_v4 }
 0x111   : > { %194 = vmatpush.bf16.msra.mxu0 %v1521_v4  ;;  %1008 = vmatpush.bf16.msra.mxu1 %v1521_v4 }
 0x115   : > { %195 = vmatpush.bf16.msra.mxu0 %v1521_v4  ;;  %1009 = vmatpush.bf16.msra.mxu1 %v1521_v4 }
 0x119   : > { %196 = vmatpush.bf16.msra.mxu0 %v1521_v4  ;;  %1010 = vmatpush.bf16.msra.mxu1 %v1521_v4 }
 0x11d   : > { %197 = vmatpush.bf16.msra.mxu0 %v1521_v4  ;;  %1011 = vmatpush.bf16.msra.mxu1 %v1521_v4 }
 0x174   : > { %v166_v9 = vpop.permute.xlu0 %165  ;;  %v172_v10 = vpop.permute.xlu1 %171 }
 0x175   : > { %vm176_vm0 = vcmp.ge.s32.totalorder %v1586_v21, %v166_v9  ;;  %vm178_vm3 = vcmp.ge.s32.totalorder %v1590_v23, %v172_v10 }
 0x17c   : > { %v169_v11 = vpop.permute.xlu0 %168  ;;  %v175_v13 = vpop.permute.xlu1 %174 }
 0x17d   : > { %vm177_vm1 = vcmp.ge.s32.totalorder %v1588_v22, %v169_v11  ;;  %vm179_vm2 = vcmp.ge.s32.totalorder %v1592_v24, %v175_v13 }
 0x17e   : > { %vm920_vm4 = vmpackc.low %vm177_vm1, %vm176_vm0 }
 0x17f   : > { %vm922_vm5 = vmpackc.low %vm179_vm2, %vm178_vm3  ;;  %921 = vmatmul.msk.bf16.vlgmr.msra.gmra.mxu0 %vm920_vm4, %v1522_v14 }
 0x180   : > { %923 = vmatmul.msk.bf16.vlgmr.msra.gmra.mxu1 %vm922_vm5, %v1522_v14 }
 0x1fc   : > { %v199_v15 = vpop.f32.mrf.mxu0 }
 0x1fd   : > { %vm209_vm6 = vcmp.ge.f32.partialorder %v199_v15, 11.0  ;;  %v204_v16 = vpop.f32.mrf.mxu1 }
 0x1fe   : > { %v213_v17 = vsel %vm209_vm6, %v160_v62, %v1458_v29   ;;  %vm211_vm7 = vcmp.ge.f32.partialorder %v204_v16, 11.0  ;;  %v217_v19 = vsel %vm209_vm6, %v199_v15, %v1442_v31  }
 0x1ff   : > { %v215_v18 = vsel %vm211_vm7, %v162_v63, %v1450_v30   ;;  %v219_v26 = vsel %vm211_vm7, %v204_v16, %v1434_v32   ;;  %v222_v39 = vsel %vm127_vm13, %v217_v19, -inf }
 0x200   : > { %v224_v29 = vsel %vm127_vm13, %v219_v26, -inf }
 0x204   : > { %v201_v20 = vpop.f32.mrf.mxu0 }
 0x205   : > { %vm210_vm8 = vcmp.ge.f32.partialorder %v201_v20, 11.0  ;;  %v206_v27 = vpop.f32.mrf.mxu1 }
 0x206   : > { %v214_v33 = vsel %vm210_vm8, %v161_v7, %v1454_v35   ;;  %v218_v34 = vsel %vm210_vm8, %v201_v20, %v1438_v36   ;;  %vm212_vm9 = vcmp.ge.f32.partialorder %v206_v27, 11.0 }
 0x207   : > { %v223_v40 = vsel %vm127_vm13, %v218_v34, -inf  ;;  %v216_v41 = vsel %vm212_vm9, %v163_v8, %v1446_v37   ;;  %v220_v42 = vsel %vm212_vm9, %v206_v27, %v1430_v38  }
 0x208   : > { %v226_v30 = vmax.f32 %v222_v39, %v223_v40  ;;  %v225_v31 = vsel %vm127_vm13, %v220_v42, -inf  ;;  %v2092_v38 = vmov %v220_v42  ;;  %v2096_v37 = vmov %v216_v41 }
 0x209   : > { %v227_v32 = vmax.f32 %v224_v29, %v225_v31  ;;  %v2095_v31 = vmov %v217_v19  ;;  %v2099_v29 = vmov %v213_v17 }
 0x20b   : > { %v228_v43 = vmax.f32 %v226_v30, %v227_v32  ;;  %v2093_v32 = vmov %v219_v26  ;;  %v2097_v30 = vmov %v215_v18 }
 0x20d   : > { %v229_v44 = vrot.slane %v228_v43, 4 }
 0x20f   : > { %v230_v35 = vmax.f32 %v228_v43, %v229_v44 }
 0x211   : > { %v231_v45 = vrot.slane %v230_v35, 2 }
 0x213   : > { %v232_v36 = vmax.f32 %v230_v35, %v231_v45  ;;  %v2098_v35 = vmov %v214_v33 }
 0x215   : > { %v233_v46 = vrot.slane %v232_v36, 1 }
 0x217   : > { %v234_v47 = vmax.f32 %v232_v36, %v233_v46  ;;  %v2094_v36 = vmov %v218_v34 }
 0x219   : > { %1022 = vpush %v234_v47 }
 0x24a   : > { %s1023_s25 = spop %1022 }
 0x24b   : > { %p236_p1 = scmp.gt.f32.partialorder %s1023_s25, 11.0 }
 0x24d   : > { %p155_p3 = pnand %p236_p1, %p154_p2 }
 0x24e   :  { %v2101_v52 = vmov (%p155_p3), %v220_v42  ;;  %v2102_v53 = vmov (%p155_p3), %v219_v26  ;;  %v2103_v54 = vmov (%p155_p3), %v218_v34  ;;  %v2104_v55 = vmov (%p155_p3), %v217_v19 }
 0x24f   :  { %158 = sbr.rel (!%p155_p3) target bundleno = 255 (0xff), region = 59  ;;  %v2105_v56 = vmov (%p155_p3), %v216_v41  ;;  %v2106_v57 = vmov (%p155_p3), %v215_v18  ;;  %v2107_v58 = vmov (%p155_p3), %v214_v33  ;;  %v2108_v59 = vmov (%p155_p3), %v213_v17 }
 0x254 PF:  { %1236 = vset.pattern.permute.xlu1 %v1519_v28  ;;  %1235 = vset.pattern.permute.xlu0 %v1519_v28  ;;  %v1798_v19 = vmov 0   ;;  %v1800_v20 = vmov 0   ;;  %v1802_v26 = vmov 0   ;;  %v1804_v27 = vmov 0   ;;  %v1494_v59 = vphi %v2091_v59, %v2108_v59   ;;  %v1490_v58 = vphi %v2090_v58, %v2107_v58   ;;  %v1486_v57 = vphi %v2089_v57, %v2106_v57   ;;  %v1482_v56 = vphi %v2088_v56, %v2105_v56   ;;  %v1478_v55 = vphi %v2087_v55, %v2104_v55   ;;  %v1474_v54 = vphi %v2086_v54, %v2103_v54   ;;  %v1470_v53 = vphi %v2085_v53, %v2102_v53   ;;  %v1466_v52 = vphi %v2084_v52, %v2101_v52  }
 0x255   :  { %244 = vperm.xlu1 %1236, %v1486_v57   ;;  %238 = vperm.xlu0 %1235, %v1494_v59  }
 0x256   :  { %263 = vmatpush.bf16.msra.mxu0 %v1516_v0  ;;  %1012 = vmatpush.bf16.msra.mxu1 %v1516_v0 }
 0x25a   :  { %264 = vmatpush.bf16.msra.mxu0 %v1516_v0  ;;  %1013 = vmatpush.bf16.msra.mxu1 %v1516_v0 }
 0x25d   :  { %247 = vperm.xlu1 %1236, %v1482_v56   ;;  %241 = vperm.xlu0 %1235, %v1490_v58  }
 0x25e   :  { %265 = vmatpush.bf16.msra.mxu0 %v1516_v0  ;;  %1014 = vmatpush.bf16.msra.mxu1 %v1516_v0 }
 0x262   :  { %266 = vmatpush.bf16.msra.mxu0 %v1516_v0  ;;  %1015 = vmatpush.bf16.msra.mxu1 %v1516_v0 }
 0x266   :  { %267 = vmatpush.bf16.msra.mxu0 %v1516_v0  ;;  %1016 = vmatpush.bf16.msra.mxu1 %v1516_v0 }
 0x26a   :  { %268 = vmatpush.bf16.msra.mxu0 %v1516_v0  ;;  %1017 = vmatpush.bf16.msra.mxu1 %v1516_v0 }
 0x26e   :  { %269 = vmatpush.bf16.msra.mxu0 %v1516_v0  ;;  %1018 = vmatpush.bf16.msra.mxu1 %v1516_v0 }
 0x272   :  { %270 = vmatpush.bf16.msra.mxu0 %v1516_v0  ;;  %1019 = vmatpush.bf16.msra.mxu1 %v1516_v0 }
 0x2c7   :  { %v1741_v28 = vpop.permute.xlu1 %244  ;;  %v1743_v37 = vpop.permute.xlu0 %238 }
 0x2c8   :  { %vm284_vm10 = vcmp.eq.s32.totalorder %v1590_v23, %v1741_v28  ;;  %vm282_vm11 = vcmp.eq.s32.totalorder %v1586_v21, %v1743_v37  ;;  %vm249_vm12 = vcmp.gt.s32.totalorder %v1586_v21, %v1743_v37  ;;  %vm251_vm3 = vcmp.gt.s32.totalorder %v1590_v23, %v1741_v28 }
 0x2cf   :  { %v1749_v38 = vpop.permute.xlu1 %247  ;;  %v1751_v48 = vpop.permute.xlu0 %241 }
 0x2d0   :  { %vm252_vm14 = vcmp.gt.s32.totalorder %v1592_v24, %v1749_v38  ;;  %vm285_vm15 = vcmp.eq.s32.totalorder %v1592_v24, %v1749_v38  ;;  %vm250_vm0 = vcmp.gt.s32.totalorder %v1588_v22, %v1751_v48  ;;  %vm283_vm1 = vcmp.eq.s32.totalorder %v1588_v22, %v1751_v48 }
 0x2d1   :  { %vm928_vm2 = vmpackc.low %vm250_vm0, %vm249_vm12 }
 0x2d2   :  { %929 = vmatmul.msk.bf16.vlgmr.msra.gmra.mxu0 %vm928_vm2, %v1518_v25  ;;  %vm930_vm4 = vmpackc.low %vm252_vm14, %vm251_vm3 }
 0x2d3   :  { %931 = vmatmul.msk.bf16.vlgmr.msra.gmra.mxu1 %vm930_vm4, %v1518_v25 }
 0x34f   :  { %v272_v0 = vpop.f32.mrf.mxu0 }
 0x350   :  { %v277_v49 = vpop.f32.mrf.mxu1  ;;  %v286_v50 = vsub.f32 %v1478_v55, %v272_v0  ;;  %v1779_v51 = vsub.f32 11.0, %v272_v0 }
 0x351   :  { %v288_v56 = vsub.f32 %v1470_v53, %v277_v49  ;;  %v1781_v57 = vsub.f32 11.0, %v277_v49 }
 0x352   :  { %v294_v59 = vsub.f32 %v286_v50, %v1779_v51 }
 0x353   :  { %v296_v63 = vsub.f32 %v288_v56, %v1781_v57 }
 0x354   :  { %v298_v53 = vsel %vm127_vm13, %v294_v59, -inf }
 0x355   :  { %v300_v9 = vsel %vm127_vm13, %v296_v63, -inf }
 0x357   :  { %v274_v58 = vpop.f32.mrf.mxu0 }
 0x358   :  { %v287_v60 = vsub.f32 %v1474_v54, %v274_v58  ;;  %v1784_v61 = vsub.f32 11.0, %v274_v58  ;;  %v279_v62 = vpop.f32.mrf.mxu1 }
 0x359   :  { %v289_v4 = vsub.f32 %v1466_v52, %v279_v62  ;;  %v1787_v7 = vsub.f32 11.0, %v279_v62 }
 0x35a   :  { %v295_v25 = vsub.f32 %v287_v60, %v1784_v61 }
 0x35b   :  { %v297_v55 = vsub.f32 %v289_v4, %v1787_v7 }
 0x35c   :  { %v299_v8 = vsel %vm127_vm13, %v295_v25, -inf }
 0x35d   :  { %v302_v10 = vmax.f32 %v298_v53, %v299_v8  ;;  %v301_v54 = vsel %vm127_vm13, %v297_v55, -inf }
 0x35e   :  { %v303_v11 = vmax.f32 %v300_v9, %v301_v54 }
 0x360   :  { %v304_v13 = vmax.f32 %v302_v10, %v303_v11 }
 0x362   :  { %v305_v14 = vrot.slane %v304_v13, 4 }
 0x364   :  { %v306_v15 = vmax.f32 %v304_v13, %v305_v14 }
 0x366   :  { %v307_v52 = vrot.slane %v306_v15, 2 }
 0x368   :  { %v308_v16 = vmax.f32 %v306_v15, %v307_v52 }
 0x36a   :  { %v309_v17 = vrot.slane %v308_v16, 1 }
 0x36c   :  { %v310_v18 = vmax.f32 %v308_v16, %v309_v17 }
 0x36e   :  { %1024 = vpush %v310_v18 }
 0x39f   :  { %s1795_s26 = spop %1024 }
 0x3a0   :  { %p312_p4 = scmp.gt.f32.partialorder %s1795_s26, 0.5 }
 0x3a1   :  { %v1523_v33 = vmov (%p312_p4), 1065369472   ;;  %v316_v34 = vsub.s32 (%p312_p4), 128, %v1579_v12  ;;  %v1524_v12 = vmov (%p312_p4), 1.0|1.0   ;;  %v1525_v29 = vmov (%p312_p4), 0  }
 0x3a2   :  { %315 = sbr.rel (!%p312_p4) target bundleno = 3024 (0xbd0), region = 28  ;;  %335 = vmatpush.bf16.msra.mxu0 (%p312_p4), %v1523_v33  ;;  %392 = vmatpush.bf16.msra.mxu1 (%p312_p4), %v1523_v33 }
 0x3a3   :  { %449 = vmatpush.bf16.msra.mxu2 (%p312_p4), %v1523_v33  ;;  %506 = vmatpush.bf16.msra.mxu3 (%p312_p4), %v1523_v33  ;;  %v1836_v39 = vsel (%p312_p4), %vm282_vm11, %v316_v34, 0  ;;  %v1841_v40 = vsel (%p312_p4), %vm283_vm1, %v316_v34, 0  ;;  %v1865_v41 = vsel (%p312_p4), %vm284_vm10, %v316_v34, 0  ;;  %v1870_v42 = vsel (%p312_p4), %vm285_vm15, %v316_v34, 0 }
 0x3a4   :  { %vm321_vm13 = vcmp.ge.s32.totalorder (%p312_p4), %v1836_v39, 128  ;;  %vm322_vm5 = vcmp.ge.s32.totalorder (%p312_p4), %v1841_v40, 128  ;;  %vm323_vm7 = vcmp.ge.s32.totalorder (%p312_p4), %v1865_v41, 128  ;;  %vm324_vm8 = vcmp.ge.s32.totalorder (%p312_p4), %v1870_v42, 128  ;;  %1237 = vset.pattern.permute.xlu0 (%p312_p4), %v1525_v29  ;;  %1238 = vset.pattern.permute.xlu1 (%p312_p4), %v1525_v29 }
 0x3a5   :  { %vm936_vm6 = vmpackc.low (%p312_p4), %vm322_vm5, %vm321_vm13  ;;  %1239 = vset.pattern.permute.xlu2 (%p312_p4), %v1525_v29 }
 0x3a6   :  { %336 = vmatpush.bf16.msra.mxu0 (%p312_p4), %v1523_v33  ;;  %393 = vmatpush.bf16.msra.mxu1 (%p312_p4), %v1523_v33  ;;  %vm938_vm9 = vmpackc.low (%p312_p4), %vm324_vm8, %vm323_vm7 }
 0x3a7   :  { %450 = vmatpush.bf16.msra.mxu2 %v1523_v33  ;;  %507 = vmatpush.bf16.msra.mxu3 %v1523_v33 }
 0x3aa   :  { %337 = vmatpush.bf16.msra.mxu0 %v1523_v33  ;;  %394 = vmatpush.bf16.msra.mxu1 %v1523_v33 }
 0x3ab   :  { %451 = vmatpush.bf16.msra.mxu2 %v1523_v33  ;;  %508 = vmatpush.bf16.msra.mxu3 %v1523_v33 }
 0x3ae   :  { %338 = vmatpush.bf16.msra.mxu0 %v1523_v33  ;;  %395 = vmatpush.bf16.msra.mxu1 %v1523_v33 }
 0x3af   :  { %452 = vmatpush.bf16.msra.mxu2 %v1523_v33  ;;  %509 = vmatpush.bf16.msra.mxu3 %v1523_v33 }
 0x3b2   :  { %339 = vmatpush.bf16.msra.mxu0 %v1523_v33  ;;  %396 = vmatpush.bf16.msra.mxu1 %v1523_v33 }
 0x3b3   :  { %453 = vmatpush.bf16.msra.mxu2 %v1523_v33  ;;  %510 = vmatpush.bf16.msra.mxu3 %v1523_v33 }
 0x3b6   :  { %340 = vmatpush.bf16.msra.mxu0 %v1523_v33  ;;  %397 = vmatpush.bf16.msra.mxu1 %v1523_v33 }
 0x3b7   :  { %454 = vmatpush.bf16.msra.mxu2 %v1523_v33  ;;  %511 = vmatpush.bf16.msra.mxu3 %v1523_v33 }
 0x3ba   :  { %341 = vmatpush.bf16.msra.mxu0 %v1523_v33  ;;  %398 = vmatpush.bf16.msra.mxu1 %v1523_v33 }
 0x3bb   :  { %455 = vmatpush.bf16.msra.mxu2 %v1523_v33  ;;  %512 = vmatpush.bf16.msra.mxu3 %v1523_v33 }
 0x3be   :  { %342 = vmatpush.bf16.msra.mxu0 %v1523_v33  ;;  %399 = vmatpush.bf16.msra.mxu1 %v1523_v33 }
 0x3bf   :  { %456 = vmatpush.bf16.msra.mxu2 %v1523_v33  ;;  %513 = vmatpush.bf16.msra.mxu3 %v1523_v33 }
 0x3c1   :  { %937 = vmatmul.msk.bf16.vlgmr.msra.gmra.mxu0 %vm936_vm6, %v1524_v12 }
 0x3c2   :  { %563 = vmatpush.bf16.msrb.mxu0 %v1523_v33  ;;  %620 = vmatpush.bf16.msrb.mxu1 %v1523_v33 }
 0x3c3   :  { %677 = vmatpush.bf16.msrb.mxu2 %v1523_v33  ;;  %734 = vmatpush.bf16.msrb.mxu3 %v1523_v33 }
 0x3c6   :  { %564 = vmatpush.bf16.msrb.mxu0 %v1523_v33  ;;  %621 = vmatpush.bf16.msrb.mxu1 %v1523_v33 }
 0x3c7   :  { %678 = vmatpush.bf16.msrb.mxu2 %v1523_v33  ;;  %735 = vmatpush.bf16.msrb.mxu3 %v1523_v33 }
 0x3ca   :  { %565 = vmatpush.bf16.msrb.mxu0 %v1523_v33  ;;  %622 = vmatpush.bf16.msrb.mxu1 %v1523_v33 }
 0x3cb   :  { %679 = vmatpush.bf16.msrb.mxu2 %v1523_v33  ;;  %736 = vmatpush.bf16.msrb.mxu3 %v1523_v33 }
 0x3ce   :  { %566 = vmatpush.bf16.msrb.mxu0 %v1523_v33  ;;  %623 = vmatpush.bf16.msrb.mxu1 %v1523_v33 }
 0x3cf   :  { %680 = vmatpush.bf16.msrb.mxu2 %v1523_v33  ;;  %737 = vmatpush.bf16.msrb.mxu3 %v1523_v33 }
 0x3d1   :  { %939 = vmatmul.msk.bf16.gmra.mxu0 %vm938_vm9, %v1524_v12 }
 0x3d2   :  { %567 = vmatpush.bf16.msrb.mxu0 %v1523_v33  ;;  %624 = vmatpush.bf16.msrb.mxu1 %v1523_v33 }
 0x3d3   :  { %681 = vmatpush.bf16.msrb.mxu2 %v1523_v33  ;;  %738 = vmatpush.bf16.msrb.mxu3 %v1523_v33 }
 0x3d6   :  { %568 = vmatpush.bf16.msrb.mxu0 %v1523_v33  ;;  %625 = vmatpush.bf16.msrb.mxu1 %v1523_v33 }
 0x3d7   :  { %682 = vmatpush.bf16.msrb.mxu2 %v1523_v33  ;;  %739 = vmatpush.bf16.msrb.mxu3 %v1523_v33 }
 0x3da   :  { %569 = vmatpush.bf16.msrb.mxu0 %v1523_v33  ;;  %626 = vmatpush.bf16.msrb.mxu1 %v1523_v33 }
 0x3db   :  { %683 = vmatpush.bf16.msrb.mxu2 %v1523_v33  ;;  %740 = vmatpush.bf16.msrb.mxu3 %v1523_v33 }
 0x3de   :  { %570 = vmatpush.bf16.msrb.mxu0 %v1523_v33  ;;  %627 = vmatpush.bf16.msrb.mxu1 %v1523_v33 }
 0x3df   :  { %684 = vmatpush.bf16.msrb.mxu2 %v1523_v33  ;;  %741 = vmatpush.bf16.msrb.mxu3 %v1523_v33 }
 0x43e   :  { %v344_v30 = vpop.f32.mrf.mxu0 }
 0x43f   :  { %vm354_vm2 = vcmp.ge.f32.partialorder %v344_v30, %v1779_v51 }
 0x440   :  { %v358_v31 = vsel %vm354_vm2, 128, %v1525_v29 }
 0x441   :  { %v362_v32 = vadd.s32 64, %v358_v31 }
 0x443   :  { %367 = vperm.xlu0 %1237, %v362_v32  }
 0x446   :  { %v346_v43 = vpop.f32.mrf.mxu0 }
 0x447   :  { %vm355_vm4 = vcmp.ge.f32.partialorder %v346_v43, %v1784_v61 }
 0x448   :  { %v359_v44 = vsel %vm355_vm4, 128, %v1525_v29 }
 0x449   :  { %v363_v35 = vadd.s32 64, %v359_v44 }
 0x44b   :  { %370 = vperm.xlu0 %1237, %v363_v35  }
 0x44e   :  { %v349_v45 = vpop.f32.mrf.mxu0 }
 0x44f   :  { %vm356_vm13 = vcmp.ge.f32.partialorder %v349_v45, %v1781_v57 }
 0x450   :  { %v360_v36 = vsel %vm356_vm13, 128, %v1525_v29 }
 0x451   :  { %v364_v46 = vadd.s32 64, %v360_v36 }
 0x453   :  { %373 = vperm.xlu1 %1238, %v364_v46  }
 0x456   :  { %v351_v47 = vpop.f32.mrf.mxu0 }
 0x457   :  { %vm357_vm5 = vcmp.ge.f32.partialorder %v351_v47, %v1787_v7 }
 0x458   :  { %v361_v0 = vsel %vm357_vm5, 128, %v1525_v29 }
 0x459   :  { %v365_v49 = vadd.s32 64, %v361_v0 }
 0x45b   :  { %376 = vperm.xlu1 %1238, %v365_v49  }
 0x4b5   :  { %v368_v50 = vpop.permute.xlu0 %367 }
 0x4b6   :  { %vm378_vm6 = vcmp.ge.s32.totalorder %v1836_v39, %v368_v50 }
 0x4bd   :  { %v371_v56 = vpop.permute.xlu0 %370 }
 0x4be   :  { %vm379_vm7 = vcmp.ge.s32.totalorder %v1841_v40, %v371_v56 }
 0x4bf   :  { %vm944_vm8 = vmpackc.low %vm379_vm7, %vm378_vm6 }
 0x4c0   :  { %945 = vmatmul.msk.bf16.vlgmr.msra.gmra.mxu1 %vm944_vm8, %v1524_v12 }
 0x4c5   :  { %v374_v58 = vpop.permute.xlu1 %373 }
 0x4c6   :  { %vm380_vm9 = vcmp.ge.s32.totalorder %v1865_v41, %v374_v58 }
 0x4cd   :  { %v377_v59 = vpop.permute.xlu1 %376 }
 0x4ce   :  { %vm381_vm2 = vcmp.ge.s32.totalorder %v1870_v42, %v377_v59 }
 0x4cf   :  { %vm946_vm4 = vmpackc.low %vm381_vm2, %vm380_vm9 }
 0x4d0   :  { %947 = vmatmul.msk.bf16.gmra.mxu1 %vm946_vm4, %v1524_v12 }
 0x53d   :  { %v401_v60 = vpop.f32.mrf.mxu1 }
 0x53e   :  { %vm411_vm13 = vcmp.ge.f32.partialorder %v401_v60, %v1779_v51 }
 0x53f   :  { %v415_v62 = vsel %vm411_vm13, %v362_v32, %v358_v31 }
 0x540   :  { %v419_v63 = vadd.s32 32, %v415_v62 }
 0x542   :  { %424 = vperm.xlu2 %1239, %v419_v63  }
 0x545   :  { %v403_v4 = vpop.f32.mrf.mxu1 }
 0x546   :  { %vm412_vm5 = vcmp.ge.f32.partialorder %v403_v4, %v1784_v61 }
 0x547   :  { %v416_v25 = vsel %vm412_vm5, %v363_v35, %v359_v44 }
 0x548   :  { %v420_v55 = vadd.s32 32, %v416_v25 }
 0x54a   :  { %427 = vperm.xlu2 %1239, %v420_v55  }
 0x54d   :  { %v406_v53 = vpop.f32.mrf.mxu1 }
 0x54e   :  { %vm413_vm6 = vcmp.ge.f32.partialorder %v406_v53, %v1781_v57 }
 0x54f   :  { %v417_v8 = vsel %vm413_vm6, %v364_v46, %v360_v36 }
 0x550   :  { %v421_v9 = vadd.s32 32, %v417_v8 }
 0x552   :  { %430 = vperm.xlu0 %1237, %v421_v9  }
 0x555   :  { %v408_v10 = vpop.f32.mrf.mxu1 }
 0x556   :  { %vm414_vm7 = vcmp.ge.f32.partialorder %v408_v10, %v1787_v7 }
 0x557   :  { %v418_v54 = vsel %vm414_vm7, %v365_v49, %v361_v0 }
 0x558   :  { %v422_v11 = vadd.s32 32, %v418_v54 }
 0x55a   :  { %433 = vperm.xlu1 %1238, %v422_v11  }
 0x59c   :  { %v425_v13 = vpop.permute.xlu2 %424 }
 0x59d   :  { %vm435_vm8 = vcmp.ge.s32.totalorder %v1836_v39, %v425_v13 }
 0x5a4   :  { %v428_v14 = vpop.permute.xlu2 %427 }
 0x5a5   :  { %vm436_vm9 = vcmp.ge.s32.totalorder %v1841_v40, %v428_v14 }
 0x5a6   :  { %vm952_vm2 = vmpackc.low %vm436_vm9, %vm435_vm8 }
 0x5a7   :  { %953 = vmatmul.msk.bf16.vlgmr.msra.gmra.mxu2 %vm952_vm2, %v1524_v12 }
 0x5c4   :  { %v431_v15 = vpop.permute.xlu0 %430 }
 0x5c5   :  { %vm437_vm4 = vcmp.ge.s32.totalorder %v1865_v41, %v431_v15 }
 0x5cc   :  { %v434_v52 = vpop.permute.xlu1 %433 }
 0x5cd   :  { %vm438_vm13 = vcmp.ge.s32.totalorder %v1870_v42, %v434_v52 }
 0x5ce   :  { %vm954_vm5 = vmpackc.low %vm438_vm13, %vm437_vm4 }
 0x5cf   :  { %955 = vmatmul.msk.bf16.gmra.mxu2 %vm954_vm5, %v1524_v12 }
 0x62a   :  { %v458_v16 = vpop.f32.mrf.mxu2 }
 0x62b   :  { %vm468_vm6 = vcmp.ge.f32.partialorder %v458_v16, %v1779_v51 }
 0x62c   :  { %v472_v17 = vsel %vm468_vm6, %v419_v63, %v415_v62 }
 0x62d   :  { %v476_v18 = vadd.s32 16, %v472_v17 }
 0x62f   :  { %481 = vperm.xlu2 %1239, %v476_v18  }
 0x632   :  { %v460_v19 = vpop.f32.mrf.mxu2 }
 0x633   :  { %vm469_vm7 = vcmp.ge.f32.partialorder %v460_v19, %v1784_v61 }
 0x634   :  { %v473_v20 = vsel %vm469_vm7, %v420_v55, %v416_v25 }
 0x635   :  { %v477_v26 = vadd.s32 16, %v473_v20 }
 0x637   :  { %484 = vperm.xlu0 %1237, %v477_v26  }
 0x652   :  { %v463_v27 = vpop.f32.mrf.mxu2 }
 0x653   :  { %vm470_vm8 = vcmp.ge.f32.partialorder %v463_v27, %v1781_v57 }
 0x654   :  { %v474_v33 = vsel %vm470_vm8, %v421_v9, %v417_v8 }
 0x655   :  { %v478_v34 = vadd.s32 16, %v474_v33 }
 0x657   :  { %487 = vperm.xlu1 %1238, %v478_v34  }
 0x65a   :  { %v465_v29 = vpop.f32.mrf.mxu2 }
 0x65b   :  { %vm471_vm9 = vcmp.ge.f32.partialorder %v465_v29, %v1787_v7 }
 0x65c   :  { %v475_v30 = vsel %vm471_vm9, %v422_v11, %v418_v54 }
 0x65d   :  { %v479_v31 = vadd.s32 16, %v475_v30 }
 0x65f   :  { %490 = vperm.xlu2 %1239, %v479_v31  }
 0x689   :  { %v482_v32 = vpop.permute.xlu2 %481 }
 0x68a   :  { %vm492_vm2 = vcmp.ge.s32.totalorder %v1836_v39, %v482_v32 }
 0x6a9   :  { %v485_v43 = vpop.permute.xlu0 %484 }
 0x6aa   :  { %vm493_vm4 = vcmp.ge.s32.totalorder %v1841_v40, %v485_v43 }
 0x6ab   :  { %vm960_vm13 = vmpackc.low %vm493_vm4, %vm492_vm2 }
 0x6ac   :  { %961 = vmatmul.msk.bf16.vlgmr.msra.gmra.mxu3 %vm960_vm13, %v1524_v12 }
 0x6b9   :  { %v491_v44 = vpop.permute.xlu2 %490 }
 0x6ba   :  { %vm495_vm5 = vcmp.ge.s32.totalorder %v1870_v42, %v491_v44 }
 0x6c9   :  { %v488_v35 = vpop.permute.xlu1 %487 }
 0x6ca   :  { %vm494_vm6 = vcmp.ge.s32.totalorder %v1865_v41, %v488_v35 }
 0x6cb   :  { %vm962_vm7 = vmpackc.low %vm495_vm5, %vm494_vm6 }
 0x6cc   :  { %963 = vmatmul.msk.bf16.gmra.mxu3 %vm962_vm7, %v1524_v12 }
 0x72f   :  { %v515_v45 = vpop.f32.mrf.mxu3 }
 0x730   :  { %vm525_vm8 = vcmp.ge.f32.partialorder %v515_v45, %v1779_v51 }
 0x731   :  { %v529_v36 = vsel %vm525_vm8, %v476_v18, %v472_v17 }
 0x732   :  { %v533_v46 = vadd.s32 8, %v529_v36 }
 0x734   :  { %538 = vperm.xlu0 %1237, %v533_v46  }
 0x737   :  { %v517_v47 = vpop.f32.mrf.mxu3 }
 0x738   :  { %vm526_vm9 = vcmp.ge.f32.partialorder %v517_v47, %v1784_v61 }
 0x739   :  { %v530_v0 = vsel %vm526_vm9, %v477_v26, %v473_v20 }
 0x73a   :  { %v534_v49 = vadd.s32 8, %v530_v0 }
 0x73c   :  { %541 = vperm.xlu1 %1238, %v534_v49  }
 0x74f   :  { %v520_v50 = vpop.f32.mrf.mxu3 }
 0x750   :  { %vm527_vm2 = vcmp.ge.f32.partialorder %v520_v50, %v1781_v57 }
 0x751   :  { %v531_v56 = vsel %vm527_vm2, %v478_v34, %v474_v33 }
 0x752   :  { %v535_v58 = vadd.s32 8, %v531_v56 }
 0x754   :  { %544 = vperm.xlu2 %1239, %v535_v58  }
 0x757   :  { %v522_v59 = vpop.f32.mrf.mxu3 }
 0x758   :  { %vm528_vm4 = vcmp.ge.f32.partialorder %v522_v59, %v1787_v7 }
 0x759   :  { %v532_v60 = vsel %vm528_vm4, %v479_v31, %v475_v30 }
 0x75a   :  { %v536_v62 = vadd.s32 8, %v532_v60 }
 0x75c   :  { %547 = vperm.xlu0 %1237, %v536_v62  }
 0x7a6   :  { %v539_v63 = vpop.permute.xlu0 %538 }
 0x7a7   :  { %vm549_vm13 = vcmp.ge.s32.totalorder %v1836_v39, %v539_v63 }
 0x7ae   :  { %v542_v4 = vpop.permute.xlu1 %541  ;;  %v545_v25 = vpop.permute.xlu2 %544 }
 0x7af   :  { %vm550_vm5 = vcmp.ge.s32.totalorder %v1841_v40, %v542_v4  ;;  %vm551_vm7 = vcmp.ge.s32.totalorder %v1865_v41, %v545_v25 }
 0x7b0   :  { %vm968_vm6 = vmpackc.low %vm550_vm5, %vm549_vm13 }
 0x7b1   :  { %969 = vmatmul.msk.bf16.vlgmr.msrb.gmra.mxu0 %vm968_vm6, %v1524_v12 }
 0x7ce   :  { %v548_v55 = vpop.permute.xlu0 %547 }
 0x7cf   :  { %vm552_vm8 = vcmp.ge.s32.totalorder %v1870_v42, %v548_v55 }
 0x7d0   :  { %vm970_vm9 = vmpackc.low %vm552_vm8, %vm551_vm7 }
 0x7d1   :  { %971 = vmatmul.msk.bf16.gmra.mxu0 %vm970_vm9, %v1524_v12 }
 0x82e   :  { %v572_v53 = vpop.f32.mrf.mxu0 }
 0x82f   :  { %vm582_vm2 = vcmp.ge.f32.partialorder %v572_v53, %v1779_v51 }
 0x830   :  { %v586_v8 = vsel %vm582_vm2, %v533_v46, %v529_v36 }
 0x831   :  { %v590_v9 = vadd.s32 4, %v586_v8 }
 0x833   :  { %595 = vperm.xlu1 %1238, %v590_v9  }
 0x836   :  { %v574_v10 = vpop.f32.mrf.mxu0 }
 0x837   :  { %vm583_vm4 = vcmp.ge.f32.partialorder %v574_v10, %v1784_v61 }
 0x838   :  { %v587_v54 = vsel %vm583_vm4, %v534_v49, %v530_v0 }
 0x839   :  { %v591_v11 = vadd.s32 4, %v587_v54 }
 0x83b   :  { %598 = vperm.xlu2 %1239, %v591_v11  }
 0x84e   :  { %v577_v13 = vpop.f32.mrf.mxu0 }
 0x84f   :  { %vm584_vm13 = vcmp.ge.f32.partialorder %v577_v13, %v1781_v57 }
 0x850   :  { %v588_v14 = vsel %vm584_vm13, %v535_v58, %v531_v56 }
 0x851   :  { %v592_v15 = vadd.s32 4, %v588_v14 }
 0x853   :  { %601 = vperm.xlu0 %1237, %v592_v15  }
 0x856   :  { %v579_v52 = vpop.f32.mrf.mxu0 }
 0x857   :  { %vm585_vm5 = vcmp.ge.f32.partialorder %v579_v52, %v1787_v7 }
 0x858   :  { %v589_v16 = vsel %vm585_vm5, %v536_v62, %v532_v60 }
 0x859   :  { %v593_v17 = vadd.s32 4, %v589_v16 }
 0x85b   :  { %604 = vperm.xlu1 %1238, %v593_v17  }
 0x895   :  { %v599_v18 = vpop.permute.xlu2 %598 }
 0x896   :  { %vm607_vm6 = vcmp.ge.s32.totalorder %v1841_v40, %v599_v18 }
 0x8a5   :  { %v596_v19 = vpop.permute.xlu1 %595 }
 0x8a6   :  { %vm606_vm7 = vcmp.ge.s32.totalorder %v1836_v39, %v596_v19 }
 0x8a7   :  { %vm976_vm8 = vmpackc.low %vm607_vm6, %vm606_vm7 }
 0x8a8   :  { %977 = vmatmul.msk.bf16.vlgmr.msrb.gmra.mxu1 %vm976_vm8, %v1524_v12 }
 0x8c5   :  { %v602_v20 = vpop.permute.xlu0 %601 }
 0x8c6   :  { %vm608_vm9 = vcmp.ge.s32.totalorder %v1865_v41, %v602_v20 }
 0x8cd   :  { %v605_v26 = vpop.permute.xlu1 %604 }
 0x8ce   :  { %vm609_vm2 = vcmp.ge.s32.totalorder %v1870_v42, %v605_v26 }
 0x8cf   :  { %vm978_vm4 = vmpackc.low %vm609_vm2, %vm608_vm9 }
 0x8d0   :  { %979 = vmatmul.msk.bf16.gmra.mxu1 %vm978_vm4, %v1524_v12 }
 0x925   :  { %v629_v27 = vpop.f32.mrf.mxu1 }
 0x926   :  { %vm639_vm13 = vcmp.ge.f32.partialorder %v629_v27, %v1779_v51 }
 0x927   :  { %v643_v33 = vsel %vm639_vm13, %v590_v9, %v586_v8 }
 0x928   :  { %v647_v34 = vadd.s32 2, %v643_v33 }
 0x92a   :  { %652 = vperm.xlu2 %1239, %v647_v34  }
 0x92d   :  { %v631_v29 = vpop.f32.mrf.mxu1 }
 0x92e   :  { %vm640_vm5 = vcmp.ge.f32.partialorder %v631_v29, %v1784_v61 }
 0x92f   :  { %v644_v30 = vsel %vm640_vm5, %v591_v11, %v587_v54 }
 0x930   :  { %v648_v31 = vadd.s32 2, %v644_v30 }
 0x932   :  { %655 = vperm.xlu0 %1237, %v648_v31  }
 0x94d   :  { %v634_v32 = vpop.f32.mrf.mxu1 }
 0x94e   :  { %vm641_vm6 = vcmp.ge.f32.partialorder %v634_v32, %v1781_v57 }
 0x94f   :  { %v645_v43 = vsel %vm641_vm6, %v592_v15, %v588_v14 }
 0x950   :  { %v649_v44 = vadd.s32 2, %v645_v43 }
 0x952   :  { %658 = vperm.xlu1 %1238, %v649_v44  }
 0x955   :  { %v636_v35 = vpop.f32.mrf.mxu1 }
 0x956   :  { %vm642_vm7 = vcmp.ge.f32.partialorder %v636_v35, %v1787_v7 }
 0x957   :  { %v646_v45 = vsel %vm642_vm7, %v593_v17, %v589_v16 }
 0x958   :  { %v650_v36 = vadd.s32 2, %v646_v45 }
 0x95a   :  { %661 = vperm.xlu2 %1239, %v650_v36  }
 0x984   :  { %v653_v46 = vpop.permute.xlu2 %652 }
 0x985   :  { %vm663_vm8 = vcmp.ge.s32.totalorder %v1836_v39, %v653_v46 }
 0x9a4   :  { %v656_v47 = vpop.permute.xlu0 %655 }
 0x9a5   :  { %vm664_vm9 = vcmp.ge.s32.totalorder %v1841_v40, %v656_v47 }
 0x9a6   :  { %vm984_vm2 = vmpackc.low %vm664_vm9, %vm663_vm8 }
 0x9a7   :  { %985 = vmatmul.msk.bf16.vlgmr.msrb.gmra.mxu2 %vm984_vm2, %v1524_v12 }
 0x9b4   :  { %v662_v0 = vpop.permute.xlu2 %661 }
 0x9b5   :  { %vm666_vm4 = vcmp.ge.s32.totalorder %v1870_v42, %v662_v0 }
 0x9c4   :  { %v659_v49 = vpop.permute.xlu1 %658 }
 0x9c5   :  { %vm665_vm13 = vcmp.ge.s32.totalorder %v1865_v41, %v659_v49 }
 0x9c6   :  { %vm986_vm5 = vmpackc.low %vm666_vm4, %vm665_vm13 }
 0x9c7   :  { %987 = vmatmul.msk.bf16.gmra.mxu2 %vm986_vm5, %v1524_v12 }
 0xa2a   :  { %v686_v50 = vpop.f32.mrf.mxu2 }
 0xa2b   :  { %vm696_vm6 = vcmp.ge.f32.partialorder %v686_v50, %v1779_v51 }
 0xa2c   :  { %v700_v56 = vsel %vm696_vm6, %v647_v34, %v643_v33 }
 0xa2d   :  { %v704_v58 = vadd.s32 1, %v700_v56 }
 0xa2f   :  { %709 = vperm.xlu0 %1237, %v704_v58  }
 0xa32   :  { %v688_v59 = vpop.f32.mrf.mxu2 }
 0xa33   :  { %vm697_vm7 = vcmp.ge.f32.partialorder %v688_v59, %v1784_v61 }
 0xa34   :  { %v701_v60 = vsel %vm697_vm7, %v648_v31, %v644_v30 }
 0xa35   :  { %v705_v62 = vadd.s32 1, %v701_v60 }
 0xa37   :  { %712 = vperm.xlu1 %1238, %v705_v62  }
 0xa4a   :  { %v691_v63 = vpop.f32.mrf.mxu2 }
 0xa4b   :  { %vm698_vm8 = vcmp.ge.f32.partialorder %v691_v63, %v1781_v57 }
 0xa4c   :  { %v702_v4 = vsel %vm698_vm8, %v649_v44, %v645_v43 }
 0xa4d   :  { %v706_v25 = vadd.s32 1, %v702_v4 }
 0xa4f   :  { %715 = vperm.xlu2 %1239, %v706_v25  }
 0xa52   :  { %v693_v55 = vpop.f32.mrf.mxu2 }
 0xa53   :  { %vm699_vm9 = vcmp.ge.f32.partialorder %v693_v55, %v1787_v7 }
 0xa54   :  { %v703_v53 = vsel %vm699_vm9, %v650_v36, %v646_v45 }
 0xa55   :  { %v707_v8 = vadd.s32 1, %v703_v53 }
 0xa57   :  { %718 = vperm.xlu0 %1237, %v707_v8  }
 0xaa1   :  { %v710_v9 = vpop.permute.xlu0 %709 }
 0xaa2   :  { %vm720_vm2 = vcmp.ge.s32.totalorder %v1836_v39, %v710_v9 }
 0xaa9   :  { %v713_v10 = vpop.permute.xlu1 %712  ;;  %v716_v54 = vpop.permute.xlu2 %715 }
 0xaaa   :  { %vm721_vm4 = vcmp.ge.s32.totalorder %v1841_v40, %v713_v10  ;;  %vm722_vm5 = vcmp.ge.s32.totalorder %v1865_v41, %v716_v54 }
 0xaab   :  { %vm992_vm13 = vmpackc.low %vm721_vm4, %vm720_vm2 }
 0xaac   :  { %993 = vmatmul.msk.bf16.vlgmr.msrb.gmra.mxu3 %vm992_vm13, %v1524_v12 }
 0xac9   :  { %v719_v11 = vpop.permute.xlu0 %718 }
 0xaca   :  { %vm723_vm6 = vcmp.ge.s32.totalorder %v1870_v42, %v719_v11 }
 0xacb   :  { %vm994_vm7 = vmpackc.low %vm723_vm6, %vm722_vm5 }
 0xacc   :  { %995 = vmatmul.msk.bf16.gmra.mxu3 %vm994_vm7, %v1524_v12 }
 0xb2f   :  { %v743_v13 = vpop.f32.mrf.mxu3 }
 0xb30   :  { %vm753_vm8 = vcmp.ge.f32.partialorder %v743_v13, %v1779_v51  ;;  %v1526_v51 = vmov 0.0  }
 0xb31   :  { %v757_v14 = vsel %vm753_vm8, %v704_v58, %v700_v56 }
 0xb32   :  { %762 = vperm.xlu1 %1238, %v757_v14  }
 0xb37   :  { %v745_v15 = vpop.f32.mrf.mxu3 }
 0xb38   :  { %vm754_vm9 = vcmp.ge.f32.partialorder %v745_v15, %v1784_v61 }
 0xb39   :  { %v758_v52 = vsel %vm754_vm9, %v705_v62, %v701_v60 }
 0xb3a   :  { %765 = vperm.xlu2 %1239, %v758_v52  }
 0xb4f   :  { %v748_v16 = vpop.f32.mrf.mxu3 }
 0xb50   :  { %vm755_vm2 = vcmp.ge.f32.partialorder %v748_v16, %v1781_v57 }
 0xb51   :  { %v759_v17 = vsel %vm755_vm2, %v706_v25, %v702_v4 }
 0xb52   :  { %768 = vperm.xlu0 %1237, %v759_v17  }
 0xb57   :  { %v750_v18 = vpop.f32.mrf.mxu3 }
 0xb58   :  { %vm756_vm4 = vcmp.ge.f32.partialorder %v750_v18, %v1787_v7 }
 0xb59   :  { %v760_v19 = vsel %vm756_vm4, %v707_v8, %v703_v53 }
 0xb5a   :  { %771 = vperm.xlu1 %1238, %v760_v19  }
 0xb94   :  { %v766_v12 = vpop.permute.xlu2 %765 }
 0xb95   :  { %vm774_vm13 = vcmp.ge.s32.totalorder %v1841_v40, %v766_v12 }
 0xb96   :  { %vm778_vm5 = vmor %vm250_vm0, %vm774_vm13 }
 0xb97   :  { %v782_v26 = vsel %vm778_vm5, 1.0, %v1526_v51  }
 0xba4   :  { %v763_v61 = vpop.permute.xlu1 %762 }
 0xba5   :  { %vm773_vm6 = vcmp.ge.s32.totalorder %v1836_v39, %v763_v61 }
 0xba6   :  { %vm777_vm7 = vmor %vm249_vm12, %vm773_vm6 }
 0xba7   :  { %v781_v27 = vsel %vm777_vm7, 1.0, %v1526_v51  }
 0xbc4   :  { %v769_v57 = vpop.permute.xlu0 %768 }
 0xbc5   :  { %vm775_vm8 = vcmp.ge.s32.totalorder %v1865_v41, %v769_v57 }
 0xbc6   :  { %vm779_vm9 = vmor %vm251_vm3, %vm775_vm8 }
 0xbc7   :  { %v783_v20 = vsel %vm779_vm9, 1.0, %v1526_v51  }
 0xbcc   :  { %v772_v7 = vpop.permute.xlu1 %771 }
 0xbcd   :  { %vm776_vm2 = vcmp.ge.s32.totalorder %v1870_v42, %v772_v7 }
 0xbce   :  { %vm780_vm4 = vmor %vm252_vm14, %vm776_vm2 }
 0xbcf   :  { %v784_v19 = vsel %vm780_vm4, 1.0, %v1526_v51  }
 0xbd0 PF:  { %vm792_vm13 = vmor %vm249_vm12, %vm282_vm11  ;;  %s1043_s27 = scalar_select %p312_p4, 0, 1  ;;  %vm816_vm12 = vcmp.gt.f32.partialorder %v1563_v2, 0.0  ;;  %vm817_vm6 = vcmp.gt.f32.partialorder %v1565_v3, 0.0  ;;  %vm819_vm7 = vcmp.gt.f32.partialorder %v1571_v6, 0.0  ;;  %v1510_v27 = vphi %v1804_v27, %v781_v27   ;;  %v1506_v26 = vphi %v1802_v26, %v782_v26   ;;  %v1502_v20 = vphi %v1800_v20, %v783_v20   ;;  %v1498_v19 = vphi %v1798_v19, %v784_v19  }
 0xbd1   :  { %vm793_vm5 = vmor %vm250_vm0, %vm283_vm1  ;;  %v796_v39 = vsel %vm792_vm13, 1.0, %v1517_v1  ;;  %s1527_s28 = smov [#allocation7]   ;;  %s846_s5 = sshll.u32 %s2082_s2, 4  ;;  %v828_v45 = vld [vmem:[#allocation8] sm:$0x1]  ;;  %s847_s5 = int_to_ptr.hbm [resolvable:$true] %s846_s5 }
 0xbd2   :  { %v797_v40 = vsel %vm793_vm5, 1.0, %v1517_v1  ;;  %vm794_vm11 = vmor %vm251_vm3, %vm284_vm10  ;;  %v1028_v21 = vstv %s1043_s27  ;;  %vm818_vm10 = vcmp.gt.f32.partialorder %v1569_v5, 0.0  ;;  %s844_s29 = sshll.u32 %s1527_s28, 4  ;;  %s1528_s2 = smov [#allocation8]   ;;  %s845_s29 = int_to_ptr.vmem [resolvable:$true] %s844_s29 }
 0xbd3   :  { %v798_v37 = vsel %vm794_vm11, 1.0, %v1517_v1  ;;  %vm795_vm0 = vmor %vm252_vm14, %vm285_vm15  ;;  %vm2031_vm1 = vcmp.ne.s32.totalorder %v1028_v21, 0  ;;  %s858_s6 = sshll.u32 %s1528_s2, 4  ;;  %s860_s9 = sshll.u32 %s2083_s3, 4  ;;  %s859_s6 = int_to_ptr.vmem [resolvable:$true] %s858_s6  ;;  %s861_s9 = int_to_ptr.hbm [resolvable:$true] %s860_s9 }
 0xbd4   :  { %v799_v23 = vsel %vm795_vm0, 1.0, %v1517_v1  ;;  %v1030_v28 = vsel %vm2031_vm1, %v796_v39, %v1510_v27  ;;  %v1034_v48 = vsel %vm2031_vm1, %v797_v40, %v1506_v26  ;;  %v1038_v24 = vsel %vm2031_vm1, %v798_v37, %v1502_v20 }
 0xbd5   :  { %v1042_v38 = vsel %vm2031_vm1, %v799_v23, %v1498_v19  ;;  %vm804_vm14 = vcmp.gt.f32.partialorder %v1030_v28, 0.0  ;;  %vm805_vm15 = vcmp.gt.f32.partialorder %v1034_v48, 0.0  ;;  %vm2046_vm3 = vcmp.gt.f32.partialorder %v1038_v24, 0.0 }
 0xbd6   :  { %v808_v42 = vsel %vm804_vm14, %v1563_v2, 0.0  ;;  %vm820_vm8 = vmand %vm804_vm14, %vm816_vm12  ;;  %v809_v20 = vsel %vm805_vm15, %v1565_v3, 0.0  ;;  %v810_v26 = vsel %vm2046_vm3, %v1569_v5, 0.0  ;;  %vm807_vm9 = vcmp.gt.f32.partialorder %v1042_v38, 0.0 }
 0xbd7   :  { %812 = vst [vmem:[#allocation7] sm:$0xff] %v808_v42  ;;  %v824_v27 = vsel %vm820_vm8, 1.0, %v1517_v1  ;;  %vm821_vm2 = vmand %vm805_vm15, %vm817_vm6  ;;  %v811_v33 = vsel %vm807_vm9, %v1571_v6, 0.0 }
 0xbd8   :  { %813 = vst [vmem:[#allocation7 + $0x8] sm:$0xff] %v809_v20  ;;  %v825_v34 = vsel %vm821_vm2, 1.0, %v1517_v1  ;;  %vm822_vm4 = vmand %vm2046_vm3, %vm818_vm10 }
 0xbd9   :  { %v829_v2 = vadd.f32 %v825_v34, %v824_v27  ;;  %814 = vst [vmem:[#allocation7 + $0x10] sm:$0xff] %v810_v26  ;;  %v826_v29 = vsel %vm822_vm4, 1.0, %v1517_v1  ;;  %vm823_vm13 = vmand %vm807_vm9, %vm819_vm7 }
 0xbda   :  { %815 = vst [vmem:[#allocation7 + $0x18] sm:$0xff] %v811_v33  ;;  %v827_v3 = vsel %vm823_vm13, 1.0, %v1517_v1 }
 0xbdb   :  { %v830_v30 = vadd.f32 %v829_v2, %v826_v29  ;;  %852 = dma.vmem_to_hbm [thread:$0]  %s845_s29, 512, %s847_s5, [#allocation4], %s1513_s20, %s1513_s20, %s1514_s21  }
 0xbdd   :  { %v831_v5 = vadd.f32 %v830_v30, %v827_v3 }
 0xbdf   :  { %v832_v31 = vrot.slane %v831_v5, 4 }
 0xbe1   :  { %v833_v32 = vadd.f32 %v832_v31, %v831_v5 }
 0xbe3   :  { %v834_v43 = vrot.slane %v833_v32, 2 }
 0xbe5   :  { %v835_v44 = vadd.f32 %v834_v43, %v833_v32 }
 0xbe7   :  { %v836_v35 = vrot.slane %v835_v44, 1 }
 0xbe9   :  { %v837_v6 = vadd.f32 %v836_v35, %v835_v44 }
 0xbeb   :  { %v838_v1 = vadd.f32 %v837_v6, %v828_v45 }
 0xbed   :  { %839 = vst [vmem:[#allocation8] sm:$0x1] %v838_v1 }
 0xbee   :  { %863 = dma.vmem_to_hbm [thread:$0]  %s859_s6, 16, %s861_s9, [#allocation9]  }
 0xbef   :  { %1424 = dma.done.wait [#allocation4], 512  }
 0xbf0   :  { %1425 = vsyncadd [#allocation4], 4294966784 }
 0xbf1   :  { %1426 = dma.done.wait [#allocation9], 16  }
 0xbf2   :  { %1427 = vsyncadd [#allocation9], 4294967280 }
 0xbf3   :  { %872 = vsyncpa [#allocation3], 1 }
 0xbf4   :  { %873 = vsyncpa [#allocation6], 1 }
 0xbf5   :  { %874 = vsyncpa [#allocation4], 1 }
 0xbf6   :  { %875 = vsyncpa [#allocation9], 1 }

</bundles_post_ra>
